<compile_context>
chip_gen: v6e
topology: v6e:2x2x1
jax: 0.10.0
libtpu: 0.0.40
codegen_flags: <defaults>
</compile_context>

<pallas_src>
import functools
from math import sqrt

import jax
import jax.numpy as jnp
from jax.experimental import pallas as pl
from jax.experimental.pallas import tpu as pltpu


def _sab_kernel(x_ref, wq_ref, bq_ref, wk_ref, bk_ref, wv_ref, bv_ref,
                wo_ref, bo_ref, o_ref, o_acc,
                *, num_heads, dim_v, block_b, seq_n):
    bb, n = block_b, seq_n
    m = bb * n

    # Flatten (Bb, N, dim_in) -> (Bb*N, dim_in) so the projection matmuls feed the
    # MXU with Bb*N rows instead of N rows.
    x = x_ref[...].reshape(m, -1)

    q = jnp.dot(x, wq_ref[...], preferred_element_type=jnp.float32) + bq_ref[...]
    k = jnp.dot(x, wk_ref[...], preferred_element_type=jnp.float32) + bk_ref[...]
    v = jnp.dot(x, wv_ref[...], preferred_element_type=jnp.float32) + bv_ref[...]

    # Fold the 1/sqrt(dim_V) softmax scale into K once (K only feeds the scores,
    # so this is exact and avoids an O(N^2) multiply per head).  The PyTorch code
    # scales by sqrt(dim_V), NOT sqrt(dim_V / num_heads) -- kept intentionally.
    k = k * (1.0 / sqrt(dim_v))

    dh = dim_v // num_heads
    qb = q.reshape(bb, n, dim_v)                        # f32, kept for the residual
    kb = k.reshape(bb, n, dim_v).astype(jnp.bfloat16)   # bf16 MXU operands,
    vb = v.reshape(bb, n, dim_v).astype(jnp.bfloat16)   # f32 accumulation

    for h in range(num_heads):                          # static unroll; num_heads small
        sl = slice(h * dh, (h + 1) * dh)
        qh = qb[:, :, sl]                               # (Bb, N, dh)
        kh = kb[:, :, sl]
        vh = vb[:, :, sl]

        # Contract on the last dims -> no explicit K transpose, MXU-direct.
        s = jnp.einsum("bnd,bmd->bnm", qh.astype(jnp.bfloat16), kh,
                       preferred_element_type=jnp.float32)          # (Bb, N, N)
        s = s - jnp.max(s, axis=-1, keepdims=True)      # numerically-stable softmax
        p = jnp.exp(s)
        p = p * pl.reciprocal(jnp.sum(p, axis=-1, keepdims=True), approx=True)

        oh = qh + jnp.einsum("bnm,bmd->bnd", p.astype(jnp.bfloat16), vh,
                             preferred_element_type=jnp.float32)    # residual on Q_

        # Slice-write into the f32 scratch (no head-output list / concatenate).
        o_acc[:, :, sl] = oh

    o = o_acc[...].reshape(m, dim_v)
    ff = jnp.dot(o, wo_ref[...], preferred_element_type=jnp.float32) + bo_ref[...]
    o = o + jnp.maximum(ff, 0.0)                        # O + relu(fc_o(O))

    o_ref[...] = o.reshape(bb, n, dim_v).astype(o_ref.dtype)


def _pick_block_b(B, N, dim_in, dim_v, budget_bytes):
    """Largest divisor Bb of B whose per-step VMEM estimate fits the budget.

    Keep the budget conservative so one tile choice is safe across v5e/v6e
    (128 MiB VMEM) and v7x (64 MiB).
    """
    f32 = 4

    def footprint(bb):
        mrows = bb * N
        x_buf = 2 * mrows * dim_in * f32            # double-buffered input block
        o_buf = 2 * mrows * dim_v * f32             # double-buffered output block
        qkv = 3 * mrows * dim_v * f32               # Q, K, V slabs
        scores = 2 * bb * N * N * f32               # s + p for one head (transient)
        acc = mrows * dim_v * f32                   # o_acc scratch
        weights = (3 * dim_in * dim_v + dim_v * dim_v + 4 * dim_v) * f32
        return x_buf + o_buf + qkv + scores + acc + weights

    best = 1
    for bb in range(1, B + 1):
        if B % bb == 0 and footprint(bb) <= budget_bytes:
            best = bb
    return best


def sab_forward(x, params, num_heads, *, block_b=None,
                vmem_budget_bytes=16 * 1024 * 1024):
    """Run the SAB forward pass with a Pallas kernel, Bb batch rows per grid step."""
    B, N, dim_in = x.shape
    dim_v = params["wq"].shape[1]
    assert dim_v % num_heads == 0

    if block_b is None:
        block_b = _pick_block_b(B, N, dim_in, dim_v, vmem_budget_bytes)
    assert B % block_b == 0, "block_b must divide the batch size"

    kernel = functools.partial(_sab_kernel, num_heads=num_heads, dim_v=dim_v,
                               block_b=block_b, seq_n=N)

    def resident(shape):
        # Constant block index -> block stays VMEM-resident across the batch grid.
        return pl.BlockSpec(shape, lambda b: (0,) * len(shape))

    return pl.pallas_call(
        kernel,
        out_shape=jax.ShapeDtypeStruct((B, N, dim_v), x.dtype),
        grid=(B // block_b,),
        in_specs=[
            pl.BlockSpec((block_b, N, dim_in), lambda b: (b, 0, 0)),  # x: Bb rows/step
            resident((dim_in, dim_v)), resident((1, dim_v)),          # Wq, bq
            resident((dim_in, dim_v)), resident((1, dim_v)),          # Wk, bk
            resident((dim_in, dim_v)), resident((1, dim_v)),          # Wv, bv
            resident((dim_v, dim_v)), resident((1, dim_v)),           # Wo, bo
        ],
        out_specs=pl.BlockSpec((block_b, N, dim_v), lambda b: (b, 0, 0)),
        scratch_shapes=[pltpu.VMEM((block_b, N, dim_v), jnp.float32)],
        compiler_params=pltpu.CompilerParams(
            dimension_semantics=("parallel",)),   # batch-blocks split across TCs on v7x
    )(x, params["wq"], params["bq"], params["wk"], params["bk"],
      params["wv"], params["bv"], params["wo"], params["bo"])


def sab_reference(x, params, num_heads):
    """Pure-JAX reference replicating the PyTorch MAB(X, X) forward (ln=False)."""
    dim_v = params["wq"].shape[1]
    q = x @ params["wq"] + params["bq"]
    k = x @ params["wk"] + params["bk"]
    v = x @ params["wv"] + params["bv"]
    dh = dim_v // num_heads
    outs = []
    for h in range(num_heads):
        qh = q[..., h * dh:(h + 1) * dh]
        kh = k[..., h * dh:(h + 1) * dh]
        vh = v[..., h * dh:(h + 1) * dh]
        s = jnp.einsum("bnd,bmd->bnm", qh, kh) / sqrt(dim_v)
        a = jax.nn.softmax(s, axis=-1)
        outs.append(qh + jnp.einsum("bnm,bmd->bnd", a, vh))
    o = jnp.concatenate(outs, axis=-1)
    o = o + jax.nn.relu(o @ params["wo"] + params["bo"])
    return o


def init_params(key, dim_in, dim_out):
    """Deterministic init mimicking nn.Linear default (uniform +-1/sqrt(fan_in))."""
    ks = jax.random.split(key, 8)

    def lin(kw, kb, fan_in, fan_out):
        bound = 1.0 / sqrt(fan_in)
        w = jax.random.uniform(kw, (fan_in, fan_out), jnp.float32, -bound, bound)
        b = jax.random.uniform(kb, (1, fan_out), jnp.float32, -bound, bound)
        return w, b

    wq, bq = lin(ks[0], ks[1], dim_in, dim_out)
    wk, bk = lin(ks[2], ks[3], dim_in, dim_out)
    wv, bv = lin(ks[4], ks[5], dim_in, dim_out)
    wo, bo = lin(ks[6], ks[7], dim_out, dim_out)
    return dict(wq=wq, bq=bq, wk=wk, bk=bk, wv=wv, bv=bv, wo=wo, bo=bo)


if __name__ == "__main__":
    B, N, DIM_IN, DIM_OUT, HEADS = 4, 16, 16, 32, 4

    key = jax.random.PRNGKey(0)
    kx, kp = jax.random.split(key)
    x = jax.random.normal(kx, (B, N, DIM_IN), jnp.float32)
    params = init_params(kp, DIM_IN, DIM_OUT)

    # block_b=2 -> grid of 2 steps, exercising the batch-block pipeline.
    out = sab_forward(x, params, HEADS, block_b=2)
    out = jax.block_until_ready(out)

    ref = sab_reference(x, params, HEADS)
    assert out.shape == (B, N, DIM_OUT)
    # bf16 attention matmuls + approx reciprocal => loosened tolerance vs f32 reference.
    err = jnp.max(jnp.abs(out - ref))
    assert jnp.allclose(out, ref, atol=2e-2, rtol=2e-2), f"mismatch vs reference, max abs err={err}"

    print("KERNEL_OK")
</pallas_src>

<mosaic_0001>
module attributes {stable_mosaic.version = 11 : i64} {
  func.func @_sab_kernel(%arg0: i32, %arg1: memref<2x16x16xf32, #tpu.memory_space<vmem>>, %arg2: memref<16x32xf32, #tpu.memory_space<vmem>>, %arg3: memref<1x32xf32, #tpu.memory_space<vmem>>, %arg4: memref<16x32xf32, #tpu.memory_space<vmem>>, %arg5: memref<1x32xf32, #tpu.memory_space<vmem>>, %arg6: memref<16x32xf32, #tpu.memory_space<vmem>>, %arg7: memref<1x32xf32, #tpu.memory_space<vmem>>, %arg8: memref<32x32xf32, #tpu.memory_space<vmem>>, %arg9: memref<1x32xf32, #tpu.memory_space<vmem>>, %arg10: memref<2x16x32xf32, #tpu.memory_space<vmem>>, %arg11: memref<2x16x32xf32, #tpu.memory_space<vmem>>) attributes {dimension_semantics = [#tpu.dimension_semantics<parallel>], iteration_bounds = array<i64: 2>, scalar_prefetch = 0 : i64, scratch_operands = 1 : i64, tpu.core_type = #tpu.core_type<tc>, window_params = [{transform_indices = @transform_0, window_bounds = array<i64: 2, 16, 16>}, {pipeline_mode = #tpu.pipeline_mode<synchronous>, transform_indices = @transform_1, window_bounds = array<i64: 16, 32>}, {pipeline_mode = #tpu.pipeline_mode<synchronous>, transform_indices = @transform_2, window_bounds = array<i64: 1, 32>}, {pipeline_mode = #tpu.pipeline_mode<synchronous>, transform_indices = @transform_3, window_bounds = array<i64: 16, 32>}, {pipeline_mode = #tpu.pipeline_mode<synchronous>, transform_indices = @transform_4, window_bounds = array<i64: 1, 32>}, {pipeline_mode = #tpu.pipeline_mode<synchronous>, transform_indices = @transform_5, window_bounds = array<i64: 16, 32>}, {pipeline_mode = #tpu.pipeline_mode<synchronous>, transform_indices = @transform_6, window_bounds = array<i64: 1, 32>}, {pipeline_mode = #tpu.pipeline_mode<synchronous>, transform_indices = @transform_7, window_bounds = array<i64: 32, 32>}, {pipeline_mode = #tpu.pipeline_mode<synchronous>, transform_indices = @transform_8, window_bounds = array<i64: 1, 32>}, {transform_indices = @transform_9, window_bounds = array<i64: 2, 16, 32>}]} {
    %c0 = arith.constant 0 : index
    %c0_0 = arith.constant 0 : index
    %c0_1 = arith.constant 0 : index
    %0 = vector.load %arg1[%c0, %c0_0, %c0_1] : memref<2x16x16xf32, #tpu.memory_space<vmem>>, vector<2x16x16xf32>
    %1 = vector.shape_cast %0 : vector<2x16x16xf32> to vector<32x16xf32>
    %c0_2 = arith.constant 0 : index
    %c0_3 = arith.constant 0 : index
    %2 = vector.load %arg2[%c0_2, %c0_3] : memref<16x32xf32, #tpu.memory_space<vmem>>, vector<16x32xf32>
    %cst = arith.constant dense<0.000000e+00> : vector<32x32xf32>
    %3 = tpu.matmul %1, %2, %cst {dimension_numbers = #tpu.dot_dimension_numbers<[1], [0], [0], [1], [0, 0, 1, 1], [], []>} : vector<32x16xf32>, vector<16x32xf32>, vector<32x32xf32> -> vector<32x32xf32>
    %c0_4 = arith.constant 0 : index
    %c0_5 = arith.constant 0 : index
    %4 = vector.load %arg3[%c0_4, %c0_5] : memref<1x32xf32, #tpu.memory_space<vmem>>, vector<1x32xf32>
    %5 = vector.broadcast %4 : vector<1x32xf32> to vector<32x32xf32>
    %6 = arith.addf %3, %5 : vector<32x32xf32>
    %c0_6 = arith.constant 0 : index
    %c0_7 = arith.constant 0 : index
    %7 = vector.load %arg4[%c0_6, %c0_7] : memref<16x32xf32, #tpu.memory_space<vmem>>, vector<16x32xf32>
    %cst_8 = arith.constant dense<0.000000e+00> : vector<32x32xf32>
    %8 = tpu.matmul %1, %7, %cst_8 {dimension_numbers = #tpu.dot_dimension_numbers<[1], [0], [0], [1], [0, 0, 1, 1], [], []>} : vector<32x16xf32>, vector<16x32xf32>, vector<32x32xf32> -> vector<32x32xf32>
    %c0_9 = arith.constant 0 : index
    %c0_10 = arith.constant 0 : index
    %9 = vector.load %arg5[%c0_9, %c0_10] : memref<1x32xf32, #tpu.memory_space<vmem>>, vector<1x32xf32>
    %10 = vector.broadcast %9 : vector<1x32xf32> to vector<32x32xf32>
    %11 = arith.addf %8, %10 : vector<32x32xf32>
    %c0_11 = arith.constant 0 : index
    %c0_12 = arith.constant 0 : index
    %12 = vector.load %arg6[%c0_11, %c0_12] : memref<16x32xf32, #tpu.memory_space<vmem>>, vector<16x32xf32>
    %cst_13 = arith.constant dense<0.000000e+00> : vector<32x32xf32>
    %13 = tpu.matmul %1, %12, %cst_13 {dimension_numbers = #tpu.dot_dimension_numbers<[1], [0], [0], [1], [0, 0, 1, 1], [], []>} : vector<32x16xf32>, vector<16x32xf32>, vector<32x32xf32> -> vector<32x32xf32>
    %c0_14 = arith.constant 0 : index
    %c0_15 = arith.constant 0 : index
    %14 = vector.load %arg7[%c0_14, %c0_15] : memref<1x32xf32, #tpu.memory_space<vmem>>, vector<1x32xf32>
    %15 = vector.broadcast %14 : vector<1x32xf32> to vector<32x32xf32>
    %16 = arith.addf %13, %15 : vector<32x32xf32>
    %cst_16 = arith.constant 0.176776692 : f32
    %17 = vector.broadcast %cst_16 : f32 to vector<32x32xf32>
    %18 = arith.mulf %11, %17 : vector<32x32xf32>
    %19 = vector.shape_cast %6 : vector<32x32xf32> to vector<2x16x32xf32>
    %20 = vector.shape_cast %18 : vector<32x32xf32> to vector<2x16x32xf32>
    %21 = arith.truncf %20 : vector<2x16x32xf32> to vector<2x16x32xbf16>
    %22 = vector.shape_cast %16 : vector<32x32xf32> to vector<2x16x32xf32>
    %23 = arith.truncf %22 : vector<2x16x32xf32> to vector<2x16x32xbf16>
    %24 = vector.extract_strided_slice %19 {offsets = [0, 0, 0], sizes = [2, 16, 8], strides = [1, 1, 1]} : vector<2x16x32xf32> to vector<2x16x8xf32>
    %25 = vector.extract_strided_slice %21 {offsets = [0, 0, 0], sizes = [2, 16, 8], strides = [1, 1, 1]} : vector<2x16x32xbf16> to vector<2x16x8xbf16>
    %26 = vector.extract_strided_slice %23 {offsets = [0, 0, 0], sizes = [2, 16, 8], strides = [1, 1, 1]} : vector<2x16x32xbf16> to vector<2x16x8xbf16>
    %27 = arith.truncf %24 : vector<2x16x8xf32> to vector<2x16x8xbf16>
    "tpu.trace_start"() <{level = 10 : i32, message = "bnd,bmd->bnm"}> : () -> ()
    %cst_17 = arith.constant dense<0.000000e+00> : vector<2x16x16xf32>
    %28 = tpu.matmul %27, %25, %cst_17 {dimension_numbers = #tpu.dot_dimension_numbers<[2], [2], [1], [1], [0, 0, 0, 1, 1, 1], [0], [0]>} : vector<2x16x8xbf16>, vector<2x16x8xbf16>, vector<2x16x16xf32> -> vector<2x16x16xf32>
    "tpu.trace_stop"() : () -> ()
    %cst_18 = arith.constant dense<0xFF800000> : vector<2x16xf32>
    %29 = vector.multi_reduction <maximumf>, %28, %cst_18 [2] : vector<2x16x16xf32> to vector<2x16xf32>
    %30 = vector.shape_cast %29 : vector<2x16xf32> to vector<2x16x1xf32>
    %31 = vector.broadcast %30 : vector<2x16x1xf32> to vector<2x16x16xf32>
    %32 = arith.subf %28, %31 : vector<2x16x16xf32>
    %33 = math.exp %32 : vector<2x16x16xf32>
    %cst_19 = arith.constant dense<0.000000e+00> : vector<2x16xf32>
    %34 = vector.multi_reduction <add>, %33, %cst_19 [2] : vector<2x16x16xf32> to vector<2x16xf32>
    %35 = vector.shape_cast %34 : vector<2x16xf32> to vector<2x16x1xf32>
    %36 = tpu.reciprocal %35 {approx = true} : vector<2x16x1xf32> -> vector<2x16x1xf32>
    %37 = vector.broadcast %36 : vector<2x16x1xf32> to vector<2x16x16xf32>
    %38 = arith.mulf %33, %37 : vector<2x16x16xf32>
    %39 = arith.truncf %38 : vector<2x16x16xf32> to vector<2x16x16xbf16>
    "tpu.trace_start"() <{level = 10 : i32, message = "bnm,bmd->bnd"}> : () -> ()
    %cst_20 = arith.constant dense<0.000000e+00> : vector<2x16x8xf32>
    %40 = tpu.matmul %39, %26, %cst_20 {dimension_numbers = #tpu.dot_dimension_numbers<[2], [1], [1], [2], [0, 0, 0, 1, 1, 2], [0], [0]>} : vector<2x16x16xbf16>, vector<2x16x8xbf16>, vector<2x16x8xf32> -> vector<2x16x8xf32>
    "tpu.trace_stop"() : () -> ()
    %41 = arith.addf %24, %40 : vector<2x16x8xf32>
    %c0_21 = arith.constant 0 : index
    %c0_22 = arith.constant 0 : index
    %c0_23 = arith.constant 0 : index
    %42 = vector.load %arg11[%c0_21, %c0_22, %c0_23] : memref<2x16x32xf32, #tpu.memory_space<vmem>>, vector<2x16x8xf32>
    tpu.vector_store %arg11[%c0_21, %c0_22, %c0_23], %41 {strides = array<i32>} : memref<2x16x32xf32, #tpu.memory_space<vmem>>, vector<2x16x8xf32>,
    %43 = vector.extract_strided_slice %19 {offsets = [0, 0, 8], sizes = [2, 16, 8], strides = [1, 1, 1]} : vector<2x16x32xf32> to vector<2x16x8xf32>
    %44 = vector.extract_strided_slice %21 {offsets = [0, 0, 8], sizes = [2, 16, 8], strides = [1, 1, 1]} : vector<2x16x32xbf16> to vector<2x16x8xbf16>
    %45 = vector.extract_strided_slice %23 {offsets = [0, 0, 8], sizes = [2, 16, 8], strides = [1, 1, 1]} : vector<2x16x32xbf16> to vector<2x16x8xbf16>
    %46 = arith.truncf %43 : vector<2x16x8xf32> to vector<2x16x8xbf16>
    "tpu.trace_start"() <{level = 10 : i32, message = "bnd,bmd->bnm"}> : () -> ()
    %cst_24 = arith.constant dense<0.000000e+00> : vector<2x16x16xf32>
    %47 = tpu.matmul %46, %44, %cst_24 {dimension_numbers = #tpu.dot_dimension_numbers<[2], [2], [1], [1], [0, 0, 0, 1, 1, 1], [0], [0]>} : vector<2x16x8xbf16>, vector<2x16x8xbf16>, vector<2x16x16xf32> -> vector<2x16x16xf32>
    "tpu.trace_stop"() : () -> ()
    %cst_25 = arith.constant dense<0xFF800000> : vector<2x16xf32>
    %48 = vector.multi_reduction <maximumf>, %47, %cst_25 [2] : vector<2x16x16xf32> to vector<2x16xf32>
    %49 = vector.shape_cast %48 : vector<2x16xf32> to vector<2x16x1xf32>
    %50 = vector.broadcast %49 : vector<2x16x1xf32> to vector<2x16x16xf32>
    %51 = arith.subf %47, %50 : vector<2x16x16xf32>
    %52 = math.exp %51 : vector<2x16x16xf32>
    %cst_26 = arith.constant dense<0.000000e+00> : vector<2x16xf32>
    %53 = vector.multi_reduction <add>, %52, %cst_26 [2] : vector<2x16x16xf32> to vector<2x16xf32>
    %54 = vector.shape_cast %53 : vector<2x16xf32> to vector<2x16x1xf32>
    %55 = tpu.reciprocal %54 {approx = true} : vector<2x16x1xf32> -> vector<2x16x1xf32>
    %56 = vector.broadcast %55 : vector<2x16x1xf32> to vector<2x16x16xf32>
    %57 = arith.mulf %52, %56 : vector<2x16x16xf32>
    %58 = arith.truncf %57 : vector<2x16x16xf32> to vector<2x16x16xbf16>
    "tpu.trace_start"() <{level = 10 : i32, message = "bnm,bmd->bnd"}> : () -> ()
    %cst_27 = arith.constant dense<0.000000e+00> : vector<2x16x8xf32>
    %59 = tpu.matmul %58, %45, %cst_27 {dimension_numbers = #tpu.dot_dimension_numbers<[2], [1], [1], [2], [0, 0, 0, 1, 1, 2], [0], [0]>} : vector<2x16x16xbf16>, vector<2x16x8xbf16>, vector<2x16x8xf32> -> vector<2x16x8xf32>
    "tpu.trace_stop"() : () -> ()
    %60 = arith.addf %43, %59 : vector<2x16x8xf32>
    %c0_28 = arith.constant 0 : index
    %c0_29 = arith.constant 0 : index
    %c8 = arith.constant 8 : index
    %61 = vector.load %arg11[%c0_28, %c0_29, %c8] : memref<2x16x32xf32, #tpu.memory_space<vmem>>, vector<2x16x8xf32>
    tpu.vector_store %arg11[%c0_28, %c0_29, %c8], %60 {strides = array<i32>} : memref<2x16x32xf32, #tpu.memory_space<vmem>>, vector<2x16x8xf32>,
    %62 = vector.extract_strided_slice %19 {offsets = [0, 0, 16], sizes = [2, 16, 8], strides = [1, 1, 1]} : vector<2x16x32xf32> to vector<2x16x8xf32>
    %63 = vector.extract_strided_slice %21 {offsets = [0, 0, 16], sizes = [2, 16, 8], strides = [1, 1, 1]} : vector<2x16x32xbf16> to vector<2x16x8xbf16>
    %64 = vector.extract_strided_slice %23 {offsets = [0, 0, 16], sizes = [2, 16, 8], strides = [1, 1, 1]} : vector<2x16x32xbf16> to vector<2x16x8xbf16>
    %65 = arith.truncf %62 : vector<2x16x8xf32> to vector<2x16x8xbf16>
    "tpu.trace_start"() <{level = 10 : i32, message = "bnd,bmd->bnm"}> : () -> ()
    %cst_30 = arith.constant dense<0.000000e+00> : vector<2x16x16xf32>
    %66 = tpu.matmul %65, %63, %cst_30 {dimension_numbers = #tpu.dot_dimension_numbers<[2], [2], [1], [1], [0, 0, 0, 1, 1, 1], [0], [0]>} : vector<2x16x8xbf16>, vector<2x16x8xbf16>, vector<2x16x16xf32> -> vector<2x16x16xf32>
    "tpu.trace_stop"() : () -> ()
    %cst_31 = arith.constant dense<0xFF800000> : vector<2x16xf32>
    %67 = vector.multi_reduction <maximumf>, %66, %cst_31 [2] : vector<2x16x16xf32> to vector<2x16xf32>
    %68 = vector.shape_cast %67 : vector<2x16xf32> to vector<2x16x1xf32>
    %69 = vector.broadcast %68 : vector<2x16x1xf32> to vector<2x16x16xf32>
    %70 = arith.subf %66, %69 : vector<2x16x16xf32>
    %71 = math.exp %70 : vector<2x16x16xf32>
    %cst_32 = arith.constant dense<0.000000e+00> : vector<2x16xf32>
    %72 = vector.multi_reduction <add>, %71, %cst_32 [2] : vector<2x16x16xf32> to vector<2x16xf32>
    %73 = vector.shape_cast %72 : vector<2x16xf32> to vector<2x16x1xf32>
    %74 = tpu.reciprocal %73 {approx = true} : vector<2x16x1xf32> -> vector<2x16x1xf32>
    %75 = vector.broadcast %74 : vector<2x16x1xf32> to vector<2x16x16xf32>
    %76 = arith.mulf %71, %75 : vector<2x16x16xf32>
    %77 = arith.truncf %76 : vector<2x16x16xf32> to vector<2x16x16xbf16>
    "tpu.trace_start"() <{level = 10 : i32, message = "bnm,bmd->bnd"}> : () -> ()
    %cst_33 = arith.constant dense<0.000000e+00> : vector<2x16x8xf32>
    %78 = tpu.matmul %77, %64, %cst_33 {dimension_numbers = #tpu.dot_dimension_numbers<[2], [1], [1], [2], [0, 0, 0, 1, 1, 2], [0], [0]>} : vector<2x16x16xbf16>, vector<2x16x8xbf16>, vector<2x16x8xf32> -> vector<2x16x8xf32>
    "tpu.trace_stop"() : () -> ()
    %79 = arith.addf %62, %78 : vector<2x16x8xf32>
    %c0_34 = arith.constant 0 : index
    %c0_35 = arith.constant 0 : index
    %c16 = arith.constant 16 : index
    %80 = vector.load %arg11[%c0_34, %c0_35, %c16] : memref<2x16x32xf32, #tpu.memory_space<vmem>>, vector<2x16x8xf32>
    tpu.vector_store %arg11[%c0_34, %c0_35, %c16], %79 {strides = array<i32>} : memref<2x16x32xf32, #tpu.memory_space<vmem>>, vector<2x16x8xf32>,
    %81 = vector.extract_strided_slice %19 {offsets = [0, 0, 24], sizes = [2, 16, 8], strides = [1, 1, 1]} : vector<2x16x32xf32> to vector<2x16x8xf32>
    %82 = vector.extract_strided_slice %21 {offsets = [0, 0, 24], sizes = [2, 16, 8], strides = [1, 1, 1]} : vector<2x16x32xbf16> to vector<2x16x8xbf16>
    %83 = vector.extract_strided_slice %23 {offsets = [0, 0, 24], sizes = [2, 16, 8], strides = [1, 1, 1]} : vector<2x16x32xbf16> to vector<2x16x8xbf16>
    %84 = arith.truncf %81 : vector<2x16x8xf32> to vector<2x16x8xbf16>
    "tpu.trace_start"() <{level = 10 : i32, message = "bnd,bmd->bnm"}> : () -> ()
    %cst_36 = arith.constant dense<0.000000e+00> : vector<2x16x16xf32>
    %85 = tpu.matmul %84, %82, %cst_36 {dimension_numbers = #tpu.dot_dimension_numbers<[2], [2], [1], [1], [0, 0, 0, 1, 1, 1], [0], [0]>} : vector<2x16x8xbf16>, vector<2x16x8xbf16>, vector<2x16x16xf32> -> vector<2x16x16xf32>
    "tpu.trace_stop"() : () -> ()
    %cst_37 = arith.constant dense<0xFF800000> : vector<2x16xf32>
    %86 = vector.multi_reduction <maximumf>, %85, %cst_37 [2] : vector<2x16x16xf32> to vector<2x16xf32>
    %87 = vector.shape_cast %86 : vector<2x16xf32> to vector<2x16x1xf32>
    %88 = vector.broadcast %87 : vector<2x16x1xf32> to vector<2x16x16xf32>
    %89 = arith.subf %85, %88 : vector<2x16x16xf32>
    %90 = math.exp %89 : vector<2x16x16xf32>
    %cst_38 = arith.constant dense<0.000000e+00> : vector<2x16xf32>
    %91 = vector.multi_reduction <add>, %90, %cst_38 [2] : vector<2x16x16xf32> to vector<2x16xf32>
    %92 = vector.shape_cast %91 : vector<2x16xf32> to vector<2x16x1xf32>
    %93 = tpu.reciprocal %92 {approx = true} : vector<2x16x1xf32> -> vector<2x16x1xf32>
    %94 = vector.broadcast %93 : vector<2x16x1xf32> to vector<2x16x16xf32>
    %95 = arith.mulf %90, %94 : vector<2x16x16xf32>
    %96 = arith.truncf %95 : vector<2x16x16xf32> to vector<2x16x16xbf16>
    "tpu.trace_start"() <{level = 10 : i32, message = "bnm,bmd->bnd"}> : () -> ()
    %cst_39 = arith.constant dense<0.000000e+00> : vector<2x16x8xf32>
    %97 = tpu.matmul %96, %83, %cst_39 {dimension_numbers = #tpu.dot_dimension_numbers<[2], [1], [1], [2], [0, 0, 0, 1, 1, 2], [0], [0]>} : vector<2x16x16xbf16>, vector<2x16x8xbf16>, vector<2x16x8xf32> -> vector<2x16x8xf32>
    "tpu.trace_stop"() : () -> ()
    %98 = arith.addf %81, %97 : vector<2x16x8xf32>
    %c0_40 = arith.constant 0 : index
    %c0_41 = arith.constant 0 : index
    %c24 = arith.constant 24 : index
    %99 = vector.load %arg11[%c0_40, %c0_41, %c24] : memref<2x16x32xf32, #tpu.memory_space<vmem>>, vector<2x16x8xf32>
    tpu.vector_store %arg11[%c0_40, %c0_41, %c24], %98 {strides = array<i32>} : memref<2x16x32xf32, #tpu.memory_space<vmem>>, vector<2x16x8xf32>,
    %c0_42 = arith.constant 0 : index
    %c0_43 = arith.constant 0 : index
    %c0_44 = arith.constant 0 : index
    %100 = vector.load %arg11[%c0_42, %c0_43, %c0_44] : memref<2x16x32xf32, #tpu.memory_space<vmem>>, vector<2x16x32xf32>
    %101 = vector.shape_cast %100 : vector<2x16x32xf32> to vector<32x32xf32>
    %c0_45 = arith.constant 0 : index
    %c0_46 = arith.constant 0 : index
    %102 = vector.load %arg8[%c0_45, %c0_46] : memref<32x32xf32, #tpu.memory_space<vmem>>, vector<32x32xf32>
    %cst_47 = arith.constant dense<0.000000e+00> : vector<32x32xf32>
    %103 = tpu.matmul %101, %102, %cst_47 {dimension_numbers = #tpu.dot_dimension_numbers<[1], [0], [0], [1], [0, 0, 1, 1], [], []>} : vector<32x32xf32>, vector<32x32xf32>, vector<32x32xf32> -> vector<32x32xf32>
    %c0_48 = arith.constant 0 : index
    %c0_49 = arith.constant 0 : index
    %104 = vector.load %arg9[%c0_48, %c0_49] : memref<1x32xf32, #tpu.memory_space<vmem>>, vector<1x32xf32>
    %105 = vector.broadcast %104 : vector<1x32xf32> to vector<32x32xf32>
    %106 = arith.addf %103, %105 : vector<32x32xf32>
    %cst_50 = arith.constant 0.000000e+00 : f32
    %107 = vector.broadcast %cst_50 : f32 to vector<32x32xf32>
    %108 = arith.maximumf %106, %107 : vector<32x32xf32>
    %109 = arith.addf %101, %108 : vector<32x32xf32>
    %110 = vector.shape_cast %109 : vector<32x32xf32> to vector<2x16x32xf32>
    %c0_51 = arith.constant 0 : index
    %c0_52 = arith.constant 0 : index
    %c0_53 = arith.constant 0 : index
    %111 = vector.load %arg10[%c0_51, %c0_52, %c0_53] : memref<2x16x32xf32, #tpu.memory_space<vmem>>, vector<2x16x32xf32>
    tpu.vector_store %arg10[%c0_51, %c0_52, %c0_53], %110 {strides = array<i32>} : memref<2x16x32xf32, #tpu.memory_space<vmem>>, vector<2x16x32xf32>,
    return
  }
  func.func @transform_0(%arg0: i32) -> (i32, i32, i32) {
    %c0_i32 = arith.constant 0 : i32
    %c0_i32_0 = arith.constant 0 : i32
    %c0_i32_1 = arith.constant 0 : i32
    return %arg0, %c0_i32, %c0_i32_0 : i32, i32, i32
  }
  func.func @transform_1(%arg0: i32) -> (i32, i32) {
    %c0_i32 = arith.constant 0 : i32
    %c0_i32_0 = arith.constant 0 : i32
    %c0_i32_1 = arith.constant 0 : i32
    return %c0_i32, %c0_i32_0 : i32, i32
  }
  func.func @transform_2(%arg0: i32) -> (i32, i32) {
    %c0_i32 = arith.constant 0 : i32
    %c0_i32_0 = arith.constant 0 : i32
    %c0_i32_1 = arith.constant 0 : i32
    return %c0_i32, %c0_i32_0 : i32, i32
  }
  func.func @transform_3(%arg0: i32) -> (i32, i32) {
    %c0_i32 = arith.constant 0 : i32
    %c0_i32_0 = arith.constant 0 : i32
    %c0_i32_1 = arith.constant 0 : i32
    return %c0_i32, %c0_i32_0 : i32, i32
  }
  func.func @transform_4(%arg0: i32) -> (i32, i32) {
    %c0_i32 = arith.constant 0 : i32
    %c0_i32_0 = arith.constant 0 : i32
    %c0_i32_1 = arith.constant 0 : i32
    return %c0_i32, %c0_i32_0 : i32, i32
  }
  func.func @transform_5(%arg0: i32) -> (i32, i32) {
    %c0_i32 = arith.constant 0 : i32
    %c0_i32_0 = arith.constant 0 : i32
    %c0_i32_1 = arith.constant 0 : i32
    return %c0_i32, %c0_i32_0 : i32, i32
  }
  func.func @transform_6(%arg0: i32) -> (i32, i32) {
    %c0_i32 = arith.constant 0 : i32
    %c0_i32_0 = arith.constant 0 : i32
    %c0_i32_1 = arith.constant 0 : i32
    return %c0_i32, %c0_i32_0 : i32, i32
  }
  func.func @transform_7(%arg0: i32) -> (i32, i32) {
    %c0_i32 = arith.constant 0 : i32
    %c0_i32_0 = arith.constant 0 : i32
    %c0_i32_1 = arith.constant 0 : i32
    return %c0_i32, %c0_i32_0 : i32, i32
  }
  func.func @transform_8(%arg0: i32) -> (i32, i32) {
    %c0_i32 = arith.constant 0 : i32
    %c0_i32_0 = arith.constant 0 : i32
    %c0_i32_1 = arith.constant 0 : i32
    return %c0_i32, %c0_i32_0 : i32, i32
  }
  func.func @transform_9(%arg0: i32) -> (i32, i32, i32) {
    %c0_i32 = arith.constant 0 : i32
    %c0_i32_0 = arith.constant 0 : i32
    %c0_i32_1 = arith.constant 0 : i32
    return %arg0, %c0_i32, %c0_i32_0 : i32, i32, i32
  }
}

</mosaic_0001>

<bundles_post_ra>
// kernel: tpu_custom_call.1
= control target key start
LH: loop header
LB: loop body
LE: loop exit
PB: predicated region body
PF: predicated region fallthrough
CT: control target
= control target key end

     0   :  { %s3192_s0 = inlined_call_operand.hbm [shape: f32[4,16,16], index: 0, kind: input, shape index: {}]   ;;  %s3193_s1 = inlined_call_operand.hbm [shape: f32[16,32], index: 1, kind: input, shape index: {}]   ;;  %s3194_s2 = inlined_call_operand.vmem [shape: f32[1,32], index: 2, kind: input, shape index: {}]   ;;  %s3195_s3 = inlined_call_operand.hbm [shape: f32[16,32], index: 3, kind: input, shape index: {}]   ;;  %s3196_s4 = inlined_call_operand.vmem [shape: f32[1,32], index: 4, kind: input, shape index: {}]   ;;  %s3197_s5 = inlined_call_operand.hbm [shape: f32[16,32], index: 5, kind: input, shape index: {}]   ;;  %s3198_s6 = inlined_call_operand.vmem [shape: f32[1,32], index: 6, kind: input, shape index: {}]   ;;  %s3199_s7 = inlined_call_operand.hbm [shape: f32[32,32], index: 7, kind: input, shape index: {}]   ;;  %s3200_s8 = inlined_call_operand.vmem [shape: f32[1,32], index: 8, kind: input, shape index: {}]   ;;  %s3201_s9 = inlined_call_operand.hbm [shape: f32[4,16,32], index: 9, kind: output, shape index: {}]  }
   0x1   :  { %3208 = sst [smem:[#allocation17_spill]] %s3193_s1 }
   0x2   :  { %3209 = sst [smem:[#allocation18_spill]] %s3195_s3 }
   0x3   :  { %3210 = sst [smem:[#allocation19_spill]] %s3197_s5 }
   0x4   :  { %14 = vsyncpa [#allocation4], 0 }
   0x5   :  { %16 = vsyncpa [#allocation4 + $0x1], 0 }
   0x6   :  { %17 = vsyncpa [#allocation7], 0 }
   0x7   :  { %18 = vsyncpa [#allocation10], 0 }
   0x8   :  { %19 = vsyncpa [#allocation5], 0 }
   0x9   :  { %21 = vsyncpa [#allocation5 + $0x1], 0  ;;  %s2714_s30 = smov 0   ;;  %s2716_s10 = smov 0  }
   0xa   :  { %s2718_s11 = smov 0   ;;  %s2720_s12 = smov 0  }
   0xb LB: > { %s2735_s13 = sadd.s32 4294967295, %s2645_s12   ;;  %s2017_s14 = sadd.s32 4294967294, %s2645_s12   ;;  %s2645_s12 = sphi %s2720_s12, %s3234_s12   ;;  %s2641_s11 = sphi %s2718_s11, %s3233_s11   ;;  %s2637_s10 = sphi %s2716_s10, %s3232_s10   ;;  %s2633_s30 = sphi %s2714_s30, %s3231_s30  }
   0xc   : > { %p47_p0 = scmp.ne.s32.totalorder %s2637_s10, %s2633_s30  ;;  %p3202_p1 = scmp.eq.s32.totalorder %s2735_s13, 0 }
   0xd   : > { %p239_p2 = scmp.eq.s32.totalorder %s2735_s13, 1  ;;  %p245_p3 = scmp.eq.s32.totalorder %s2017_s14, 1 }
   0xe   : > { %p2744_p4 = por %p3202_p1, %p47_p0  ;;  %p2018_p5 = scmp.ge.s32.totalorder %s2645_s12, 1 }
   0xf   : > { %p2749_p6 = por %p245_p3, %p47_p0  ;;  %p252_p7 = scmp.lt.s32.totalorder %s2645_s12, 3 }
  0x10   : > { %s3211_s15 = scalar_select %p2744_p4, 1, 0 }
  0x11   : > { %s3212_s16 = scalar_select %p2749_p6, 1, 0 }
  0x12   : > { %p2754_p8 = pnand %p2018_p5, %p252_p7  ;;  %s2647_s18 = smov [#allocation6]  }
  0x13   : > { %s264_s19 = sshll.u32 %s2647_s18, 4  ;;  %s2648_s21 = smov [#allocation9]   ;;  %s265_s19 = int_to_ptr.vmem [resolvable:$true] %s264_s19 }
  0x14   : > { %s3213_s17 = scalar_select %p2754_p8, 1, 0 }
  0x15   : > { %p2299_p9 = pneg %p2754_p8  ;;  %s296_s22 = sshll.u32 %s2648_s21, 4  ;;  %s297_s22 = int_to_ptr.vmem [resolvable:$true] %s296_s22 }
  0x16   : > { %s2649_s23 = smov [#allocation8]   ;;  %s2452_s25 = scalar_lea.vmem %s265_s19, 256 }
  0x17   : > { %p2763_p11 = pnand %p2299_p9, %p3202_p1  ;;  %s280_s24 = sshll.u32 %s2649_s23, 4  ;;  %s281_s24 = int_to_ptr.vmem [resolvable:$true] %s280_s24 }
  0x18   : > { %p2453_p13 = scmp.ne.s32.totalorder %s265_s19, %s2452_s25  ;;  %p2460_p5 = scmp.lt.s32.totalorder %s265_s19, %s265_s19 }
  0x19   : > { %p2443_p12 = pneg %p2763_p11  ;;  %p2461_p7 = scmp.lt.s32.totalorder %s2452_s25, %s2452_s25 }
  0x1b   : > { %p2455_p0 = pnand %p2453_p13, %p2443_p12  ;;  %p2462_p9 = por %p2461_p7, %p2460_p5 }
  0x1d   : > { %p2456_p3 = pneg %p2455_p0 }
  0x1f   : > { %p2463_p10 = pnand %p2462_p9, %p2456_p3 }
  0x21   : > { %2466 = shalt.err (!%p2463_p10)
}
  0x22   : > { %s3203_s26 = smov 128   ;;  %s3204_s27 = smov 8  }
  0x23   : > { %s3215_s1 = sld [smem:[#allocation17_spill]]  ;;  %s2478_s14 = scalar_lea.vmem %s297_s22, 256 }
  0x24   : > { %p2479_p13 = scmp.ne.s32.totalorder %s297_s22, %s2478_s14  ;;  %p2486_p3 = scmp.lt.s32.totalorder %s297_s22, %s297_s22 }
  0x25   : > { %p2487_p10 = scmp.lt.s32.totalorder %s2478_s14, %s2478_s14 }
  0x26   : > { %p2481_p0 = pnand %p2479_p13, %p2443_p12 }
  0x27   : > { %p2488_p7 = por %p2487_p10, %p2486_p3 }
  0x28   : > { %p2482_p5 = pneg %p2481_p0 }
  0x29   : > { %2302 = dma.hbm_to_vmem [thread:$0]  (!%p2763_p11), %s3215_s1, 256, %s265_s19, [#allocation7], %s3203_s26, %s3203_s26, %s3204_s27  }
  0x2a   : > { %p2489_p9 = pnand %p2488_p7, %p2482_p5 }
  0x2c   : > { %2492 = shalt.err (!%p2489_p9)
}
  0x2d   : > { %s3216_s5 = sld [smem:[#allocation19_spill]]  ;;  %s2504_s19 = scalar_lea.vmem %s281_s24, 256 }
  0x2e   : > { %p2505_p1 = scmp.ne.s32.totalorder %s281_s24, %s2504_s19  ;;  %p2512_p3 = scmp.lt.s32.totalorder %s281_s24, %s281_s24 }
  0x2f   : > { %p2513_p5 = scmp.lt.s32.totalorder %s2504_s19, %s2504_s19 }
  0x30   : > { %p2507_p13 = pnand %p2505_p1, %p2443_p12 }
  0x31   : > { %p2514_p10 = por %p2513_p5, %p2512_p3 }
  0x32   : > { %p2508_p0 = pneg %p2507_p13 }
  0x33   : > { %2308 = dma.hbm_to_vmem [thread:$0]  (!%p2763_p11), %s3216_s5, 256, %s297_s22, [#allocation10], %s3203_s26, %s3203_s26, %s3204_s27  }
  0x34   : > { %p2515_p7 = pnand %p2514_p10, %p2508_p0 }
  0x36   : > { %2518 = shalt.err (!%p2515_p7)
}
  0x37   : > { %s3217_s3 = sld [smem:[#allocation18_spill]]  ;;  %s2652_s22 = smov [#allocation11]  }
  0x38   : > { %s312_s28 = sshll.u32 %s2652_s22, 4  ;;  %s313_s28 = int_to_ptr.vmem [resolvable:$true] %s312_s28 }
  0x39   : > { %s2530_s29 = scalar_lea.vmem %s313_s28, 512  ;;  %p2538_p0 = scmp.lt.s32.totalorder %s313_s28, %s313_s28 }
  0x3a   : > { %p2531_p1 = scmp.ne.s32.totalorder %s313_s28, %s2530_s29  ;;  %p2539_p3 = scmp.lt.s32.totalorder %s2530_s29, %s2530_s29 }
  0x3c   : > { %p2533_p9 = pnand %p2531_p1, %p2443_p12  ;;  %p2540_p5 = por %p2539_p3, %p2538_p0 }
  0x3d   : > { %2305 = dma.hbm_to_vmem [thread:$0]  (!%p2763_p11), %s3217_s3, 256, %s281_s24, [#allocation7], %s3203_s26, %s3203_s26, %s3204_s27  }
  0x3e   : > { %p2534_p13 = pneg %p2533_p9 }
  0x40   : > { %p2541_p10 = pnand %p2540_p5, %p2534_p13 }
  0x42   : > { %2544 = shalt.err (!%p2541_p10)
}
  0x43   : > { %2311 = dma.hbm_to_vmem [thread:$0]  (!%p2763_p11), %s3199_s7, 512, %s313_s28, [#allocation10], %s3203_s26, %s3203_s26, %s3204_s27  }
  0x44   : > { %s2814_s18 = sadd.s32 1, %s2645_s12   ;;  %s34_s20 = sadd.s32 1, %s2641_s11 }
  0x45   : > { %s31_s21 = ssub.s32 %s2645_s12, %s2814_s18  ;;  %p41_p12 = scmp.ne.s32.totalorder %s2641_s11, %s2637_s10 }
  0x46   : > { %p32_p7 = scmp.eq.s32.totalorder %s31_s21, 0  ;;  %p42_p1 = scmp.eq.s32.totalorder %s2645_s12, 0 }
  0x47   : > { %p2824_p9 = por %p239_p2, %p41_p12  ;;  %p2324_p13 = scmp.lt.s32.totalorder %s2645_s12, 2 }
  0x48   : > { %s2830_s23 = scalar_select %p32_p7, %s2641_s11, %s34_s20  }
  0x49   : > { %s3218_s19 = scalar_select %p2824_p9, 1, 0 }
  0x4a   : > { %p43_p0 = por %p42_p1, %p41_p12  ;;  %s329_s25 = sand.u32 1, %s2641_s11  }
  0x4b   : > { %s2024_s22 = sshll.u32 %s329_s25, 5  ;;  %s2078_s28 = sshll.u32 %s2645_s12, 9 }
  0x4c   : > { %s2837_s14 = scalar_lea.hbm %s3192_s0, %s2078_s28  ;;  %s333_s21 = scalar_lea.vmem [#allocation3], %s2024_s22 }
  0x4d   : > { %s341_s26 = sshll.u32 %s333_s21, 4  ;;  %p2841_p2 = pnand %p2324_p13, %p43_p0  ;;  %s2839_s26 = int_to_ptr.vmem [resolvable:$true] %s341_s26 }
  0x4e   : > { %s2845_s20 = scalar_lea.sflag [#allocation4], %s329_s25  ;;  %s2545_s1 = scalar_lea.hbm %s2837_s14, 512 }
  0x4f   : > { %p2546_p11 = scmp.ne.s32.totalorder %s2837_s14, %s2545_s1  ;;  %p2547_p3 = pneg %p2841_p2 }
  0x50   : > { %s2550_s22 = scalar_lea.hbm %s3192_s0, 1024  ;;  %p2551_p12 = scmp.lt.s32.totalorder %s2837_s14, %s3192_s0 }
  0x51   : > { %p2548_p5 = pnand %p2547_p3, %p2546_p11  ;;  %p2552_p7 = scmp.lt.s32.totalorder %s2550_s22, %s2545_s1 }
  0x53   : > { %p2549_p10 = pneg %p2548_p5  ;;  %p2553_p1 = por %p2552_p7, %p2551_p12 }
  0x55   : > { %p2554_p13 = pnand %p2553_p1, %p2549_p10 }
  0x57   : > { %2557 = shalt.err (!%p2554_p13)
}
  0x58   : > { %s2558_s25 = scalar_lea.vmem %s2839_s26, 512  ;;  %s2653_s3 = smov [#allocation3]  }
  0x59   : > { %p2559_p0 = scmp.ne.s32.totalorder %s2839_s26, %s2558_s25  ;;  %s2563_s5 = sshll.u32 %s2653_s3, 4  ;;  %s2564_s5 = int_to_ptr.vmem [resolvable:$false] %s2563_s5 }
  0x5a   : > { %s2565_s28 = scalar_lea.vmem %s2564_s5, 1024  ;;  %p2566_p5 = scmp.lt.s32.totalorder %s2839_s26, %s2564_s5 }
  0x5b   : > { %p2561_p6 = pnand %p2559_p0, %p2547_p3  ;;  %p2567_p9 = scmp.lt.s32.totalorder %s2565_s28, %s2558_s25 }
  0x5d   : > { %p2562_p11 = pneg %p2561_p6  ;;  %p2568_p4 = por %p2567_p9, %p2566_p5 }
  0x5f   : > { %p2569_p8 = pnand %p2568_p4, %p2562_p11 }
  0x61   : > { %2572 = shalt.err (!%p2569_p8)
}
  0x62   : > { %s3220_s1 = smov 8   ;;  %s3221_s29 = smov 128  }
  0x63   : > { %2315 = dma.hbm_to_vmem [thread:$0]  (!%p2841_p2), %s2837_s14, 512, %s2839_s26, %s2845_s20, %s3221_s29, %s3221_s29, %s3220_s1  }
  0x64   : > { %p3222_p6 = scmp.ne.s32.totalorder %s3213_s17, 0 }
  0x65   : > { %s2872_s3 = sand.u32 (!%p3222_p6), 1, %s2637_s10   ;;  %p3223_p4 = scmp.ne.s32.totalorder (!%p3222_p6), %s3211_s15, 0 }
  0x66   : > { %353 = sbr.rel (%p3222_p6) target bundleno = 3029 (0xbd5), region = 56  ;;  %s2029_s5 = sshll.u32 (!%p3222_p6), %s2872_s3, 5 }
  0x67   : > { %s356_s22 = scalar_lea.sflag (!%p3222_p6), [#allocation4], %s2872_s3  ;;  %s359_s27 = scalar_lea.vmem (!%p3222_p6), [#allocation3], %s2029_s5 }
  0x6b   : > { %2616 = dma.done.wait (%p3223_p4), %s356_s22, 512  }
  0x6c   : > { %2618 = vsyncadd (%p3223_p4), %s356_s22, 4294966784  ;;  %p3224_p8 = scmp.eq.s32.totalorder %s2735_s13, 0 }
  0x6e   : > { %2620 = dma.done.wait (%p3224_p8), [#allocation7], 512   ;;  %p3225_p9 = pmov %p3224_p8 }
  0x6f   : > { %p3226_p2 = pmov %p3224_p8 }
  0x70   : > { %2622 = vsyncadd (%p3225_p9), [#allocation7], 4294966784 }
  0x71   : > { %2624 = dma.done.wait (%p3226_p2), [#allocation10], 768   ;;  %p3227_p3 = pmov %p3226_p2 }
  0x72   : > { %vm426_vm0 = vcmask 130048   ;;  %v525_v0 = vld [vmem:[#allocation8 + $0x8] sm:$0xff]  ;;  %v524_v1 = vld [vmem:[#allocation8] sm:$0xff]  ;;  %v413_v2 = vld [vmem:[%s359_s27] sm:$0xff]  ;;  %v2654_v9 = vmov 0.0   ;;  %vm2655_vm1 = vmmov 0  }
  0x73   : > { %2626 = vsyncadd (%p3227_p3), [#allocation10], 4294966528  ;;  %2149 = vmatprep.subr.mxu1 %v525_v0  ;;  %2153 = vmatprep.mubr.msk.f32.mxu1 %vm426_vm0, %v413_v2  ;;  %v418_v3 = vld [vmem:[#allocation6 + $0x8] sm:$0xff]  ;;  %v417_v5 = vld [vmem:[#allocation6] sm:$0xff]  ;;  %vm722_vm2 = vcmask 64512   ;;  %s2656_s21 = smov 120  }
  0x74   : > { %2150 = vmatpush3.msra.mxu1 %v525_v0  ;;  %v414_v4 = vld [vmem:[%s359_s27 + $0x8] sm:$0xff]  ;;  %2139 = vmatprep.subr.mxu0 %v418_v3  ;;  %v415_v6 = vld [vmem:[%s359_s27 + $0x10] sm:$0xff]  ;;  %v416_v7 = vld [vmem:[%s359_s27 + $0x18] sm:$0xff]  ;;  %s2657_s25 = smov 112   ;;  %s2658_s28 = smov 104   ;;  %vm1227_vm3 = vcmask 130112  }
  0x75   : > { %2151 = vmatprep.subr.mxu1 %v524_v1  ;;  %2140 = vmatpush3.msra.mxu0 %v418_v3  ;;  %v619_v8 = vld [vmem:[#allocation9 + $0x8] sm:$0xff]  ;;  %v618_v10 = vld [vmem:[#allocation9] sm:$0xff]  ;;  %s2659_s1 = smov 8   ;;  %s2660_s29 = smov 16   ;;  %vm1494_vm4 = vcmask 195712   ;;  %vm1761_vm5 = vcmask 261312  }
  0x76   : > { %2152 = vmatpush3.msra.mxu1 %v524_v1  ;;  %2141 = vmatprep.subr.mxu0 %v417_v5  ;;  %v2040_v11 = vld [vmem:[%s3196_s4] ss:$0 sm:$0xff]  ;;  %s2661_s22 = smov 24   ;;  %vm1781_vm6 = vcmask 261120   ;;  %s409_s17 = scalar_lea.vmem [#allocation12], %s2029_s5 }
  0x77   : > { %2154 = vmatmul.mubr.msk.f32.vlgmr.msra.gmra.mxu1 %vm426_vm0, %v414_v4  ;;  %2142 = vmatpush3.msra.mxu0 %v417_v5  ;;  %v2035_v27 = vld [vmem:[%s3194_s2] ss:$0 sm:$0xff]  ;;  %s1906_s26 = sshll.u32 %s409_s17, 4  ;;  %s2080_s14 = sshll.u32 %s2735_s13, 9  ;;  %s3141_s26 = int_to_ptr.vmem [resolvable:$true] %s1906_s26 }
  0x78   : > { %2156 = vmatprep.mubr.msk.f32.mxu1 %vm426_vm0, %v415_v6  ;;  %2143 = vmatprep.mubr.msk.f32.mxu0 %vm426_vm0, %v413_v2  ;;  %v2045_v39 = vld [vmem:[%s3198_s6] ss:$0 sm:$0xff]  ;;  %s3147_s24 = scalar_lea.hbm %s3201_s9, %s2080_s14  ;;  %p3228_p12 = scmp.ne.s32.totalorder %s3218_s19, 0 }
  0x79   : > { %2144 = vmatmul.mubr.msk.f32.vlgmr.msra.gmra.mxu0 %vm426_vm0, %v414_v4  ;;  %2159 = vmatprep.subr.mxu0 %v619_v8  ;;  %s2662_s13 = smov [#allocation12]  }
  0x7a   : > { %2146 = vmatprep.mubr.msk.f32.mxu0 %vm426_vm0, %v415_v6  ;;  %2169 = vmatprep.subr.bf16.mxu1 %v2654_v9 }
  0x7b   : > { %2157 = vmatmul.mubr.msk.f32.gmra.mxu1 %vm426_vm0, %v416_v7  ;;  %2160 = vmatpush3.msra.mxu0 %v619_v8 }
  0x7c   : > { %2161 = vmatprep.subr.mxu0 %v618_v10  ;;  %2171 = vmatprep.mubr.msk.bf16.mxu1 %vm2655_vm1, %v2654_v9 }
  0x7d   : > { %2147 = vmatmul.mubr.msk.f32.gmra.mxu0 %vm426_vm0, %v416_v7 }
  0x7e   : > { %2163 = vmatprep.mubr.msk.f32.mxu0 %vm426_vm0, %v413_v2  ;;  %2162 = vmatpush3.msra.mxu0 %v618_v10 }
  0x7f   : > { %2175 = vmatprep.subr.bf16.mxu0 %v2654_v9 }
  0x81   : > { %2164 = vmatmul.mubr.msk.f32.vlgmr.msra.gmra.mxu0 %vm426_vm0, %v414_v4 }
  0x82   : > { %2166 = vmatprep.mubr.msk.f32.mxu0 %vm426_vm0, %v415_v6 }
  0x85   : > { %2167 = vmatmul.mubr.msk.f32.gmra.mxu0 %vm426_vm0, %v416_v7 }
  0x86   : > { %2177 = vmatprep.mubr.msk.bf16.mxu0 %vm2655_vm1, %v2654_v9 }
 0x137   : > { %v2155_v12 = vpop.f32.mrf.mxu1 }
 0x138   : > { %v605_v13 = vadd.f32 %v2155_v12, %v2040_v11 }
 0x139   : > { %v599_v14 = vpop.f32.mrf.mxu1  ;;  %v2145_v15 = vpop.f32.mrf.mxu0 }
 0x13a   : > { %v600_v16 = vadd.f32 %v2040_v11, %v599_v14  ;;  %v713_v19 = vmul.f32 0.17677669, %v605_v13  ;;  %v2920_v32 = vadd.f32 %v2145_v15, %v2035_v27 }
 0x13b   : > { %v2158_v17 = vpop.f32.mrf.mxu1  ;;  %v505_v18 = vpop.f32.mrf.mxu0 }
 0x13c   : > { %v712_v20 = vmul.f32 0.17677669, %v600_v16  ;;  %v615_v21 = vadd.f32 %v2158_v17, %v2040_v11  ;;  %v2922_v33 = vadd.f32 %v2035_v27, %v505_v18 }
 0x13d   : > { %v609_v22 = vpop.f32.mrf.mxu1  ;;  %v2148_v23 = vpop.f32.mrf.mxu0 }
 0x13e   : > { %v2911_v24 = vpack.c.bf16 %v713_v19, %v712_v20  ;;  %v715_v25 = vmul.f32 0.17677669, %v615_v21  ;;  %v610_v26 = vadd.f32 %v2040_v11, %v609_v22  ;;  %v2925_v34 = vadd.f32 %v2148_v23, %v2035_v27 }
 0x13f   : > { %v515_v30 = vpop.f32.mrf.mxu0  ;;  %v2933_v37 = vpack.c.bf16 %v2920_v32, %v2922_v33 }
 0x140   : > { %v714_v28 = vmul.f32 0.17677669, %v610_v26  ;;  %v727_v29 = vsel %vm722_vm2, %v2911_v24, 0  ;;  %v2929_v36 = vadd.f32 %v2035_v27, %v515_v30 }
 0x141   : > { %2170 = vmatpush3.bf16.xpose.msra.mxu1 %v727_v29  ;;  %v2165_v40 = vpop.f32.mrf.mxu0 }
 0x142   : > { %v2918_v31 = vpack.c.bf16 %v715_v25, %v714_v28  ;;  %2181 = vmatprep.subr.bf16.mxu1 %v2654_v9  ;;  %v2938_v38 = vpack.c.bf16 %v2925_v34, %v2929_v36  ;;  %v699_v41 = vadd.f32 %v2165_v40, %v2045_v39 }
 0x143   : > { %v693_v42 = vpop.f32.mrf.mxu0 }
 0x144   : > { %v774_v35 = vsel %vm722_vm2, %v2918_v31, 0  ;;  %v694_v43 = vadd.f32 %v2045_v39, %v693_v42 }
 0x145   : > { %2176 = vmatpush3.bf16.xpose.msra.mxu0 %v774_v35  ;;  %v2168_v44 = vpop.f32.mrf.mxu0 }
 0x146   : > { %2187 = vmatprep.subr.bf16.mxu0 %v2654_v9  ;;  %v2951_v45 = vpack.c.bf16 %v699_v41, %v694_v43  ;;  %v709_v46 = vadd.f32 %v2168_v44, %v2045_v39 }
 0x147   : > { %v703_v47 = vpop.f32.mrf.mxu0 }
 0x148   : > { %2172 = vmatmul.mubr.msk.bf16.vlgmr.msra.gmra.mxu1 %vm722_vm2, %v2933_v37  ;;  %v704_v48 = vadd.f32 %v2045_v39, %v703_v47 }
 0x149   : > { %2183 = vmatprep.mubr.msk.bf16.mxu1 %vm2655_vm1, %v2654_v9  ;;  %2182 = vmatpush3.bf16.msra.mxu1 %v2951_v45 }
 0x14a   : > { %2193 = vmatprep.subr.bf16.mxu1 %v2654_v9  ;;  %v2955_v49 = vpack.c.bf16 %v709_v46, %v704_v48 }
 0x14c   : > { %2178 = vmatmul.mubr.msk.bf16.vlgmr.msra.gmra.mxu0 %vm722_vm2, %v2938_v38 }
 0x14d   : > { %2189 = vmatprep.mubr.msk.bf16.mxu0 %vm2655_vm1, %v2654_v9  ;;  %2188 = vmatpush3.bf16.msra.mxu0 %v2955_v49 }
 0x14e   : > { %2199 = vmatprep.subr.bf16.mxu0 %v2654_v9 }
 0x208   : > { %v763_v50 = vpop.f32.mrf.mxu1 }
 0x209   : > { %v817_v51 = vsel %vm426_vm0, %v763_v50, -inf }
 0x20a   : > { %818 = vmax.xlane.f32.xlu0 %v817_v51  ;;  %v2173_v52 = vpop.f32.mrf.mxu1 }
 0x20c   : > { %v766_v53 = vpop.f32.mrf.mxu1  ;;  %v810_v54 = vpop.f32.mrf.mxu0 }
 0x20d   : > { %v823_v55 = vsel %vm426_vm0, %v810_v54, -inf  ;;  %v820_v56 = vsel %vm426_vm0, %v766_v53, -inf }
 0x20e   : > { %824 = vmax.xlane.f32.xlu1 %v823_v55  ;;  %v2179_v57 = vpop.f32.mrf.mxu0  ;;  %821 = vmax.xlane.f32.xlu0 %v820_v56  ;;  %v2174_v58 = vpop.f32.mrf.mxu1 }
 0x210   : > { %v813_v59 = vpop.f32.mrf.mxu0 }
 0x211   : > { %v826_v60 = vsel %vm426_vm0, %v813_v59, -inf }
 0x212   : > { %827 = vmax.xlane.f32.xlu1 %v826_v60  ;;  %v2180_v61 = vpop.f32.mrf.mxu0 }
 0x293   : > { %v819_v62 = vpop.xlane.xlu0 %818 }
 0x294   : > { %v829_v63 = vsub.f32 %v763_v50, %v819_v62 }
 0x296   : > { %v833_v0 = vmul.f32 1.442695, %v829_v63 }
 0x297   : > { %v825_v1 = vpop.xlane.xlu1 %824  ;;  %v822_v2 = vpop.xlane.xlu0 %821 }
 0x298   : > { %2377 = vpow2.f32 %v833_v0  ;;  %v831_v3 = vsub.f32 %v810_v54, %v825_v1  ;;  %v830_v4 = vsub.f32 %v766_v53, %v822_v2 }
 0x29a   : > { %v837_v5 = vmul.f32 1.442695, %v831_v3  ;;  %v835_v6 = vmul.f32 1.442695, %v830_v4 }
 0x29b   : > { %v828_v14 = vpop.xlane.xlu1 %827 }
 0x29c   : > { %2379 = vpow2.f32 %v837_v5  ;;  %v832_v15 = vsub.f32 %v813_v59, %v828_v14 }
 0x29d   : > { %2381 = vpow2.f32 %v835_v6 }
 0x29e   : > { %v839_v16 = vmul.f32 1.442695, %v832_v15 }
 0x2a0   : > { %2383 = vpow2.f32 %v839_v16 }
 0x2a5   : > { %v2378_v7 = vpop.eup %2377 }
 0x2a6   : > { %v841_v8 = vsel %vm426_vm0, %v2378_v7, 0.0 }
 0x2a7   : > { %842 = vadd.xlane.f32.xlu0 %v841_v8 }
 0x2a9   : > { %v2380_v10 = vpop.eup %2379 }
 0x2aa   : > { %v2382_v11 = vpop.eup %2381  ;;  %v847_v12 = vsel %vm426_vm0, %v2380_v10, 0.0 }
 0x2ab   : > { %848 = vadd.xlane.f32.xlu0 %v847_v12  ;;  %v844_v13 = vsel %vm426_vm0, %v2382_v11, 0.0 }
 0x2ac   : > { %845 = vadd.xlane.f32.xlu1 %v844_v13 }
 0x2ad   : > { %v2384_v17 = vpop.eup %2383 }
 0x2ae   : > { %v850_v18 = vsel %vm426_vm0, %v2384_v17, 0.0 }
 0x2bd   : > { %1016 = vrot.lane.b32.xlu1 %v2918_v31, %s2656_s21 }
 0x2c1   : > { %963 = vrot.lane.b32.xlu0 %v2911_v24, %s2656_s21 }
 0x2e1   : > { %851 = vadd.xlane.f32.xlu1 %v850_v18 }
 0x2f2   : > { %960 = vrot.lane.b32.xlu1 %v2933_v37, %s2656_s21 }
 0x2f6   : > { %1013 = vrot.lane.b32.xlu1 %v2938_v38, %s2656_s21 }
 0x330   : > { %v843_v19 = vpop.xlane.xlu0 %842 }
 0x331   : > { %2385 = vrcp.f32 %v843_v19 }
 0x334   : > { %v849_v21 = vpop.xlane.xlu0 %848 }
 0x335   : > { %v846_v20 = vpop.xlane.xlu1 %845 }
 0x336   : > { %2387 = vrcp.f32 %v846_v20 }
 0x337   : > { %2389 = vrcp.f32 %v849_v21 }
 0x338   : > { %v964_v27 = vpop.permute.xlu0 %963 }
 0x339   : > { %v969_v29 = vsel %vm722_vm2, %v964_v27, 0  ;;  %v1017_v30 = vpop.permute.xlu1 %1016 }
 0x33a   : > { %v1022_v46 = vsel %vm722_vm2, %v1017_v30, 0 }
 0x33e   : > { %v2386_v22 = vpop.eup %2385 }
 0x33f   : > { %v857_v25 = vmul.f32 %v2386_v22, %v2378_v7 }
 0x343   : > { %v2388_v23 = vpop.eup %2387 }
 0x344   : > { %v858_v26 = vmul.f32 %v2388_v23, %v2382_v11  ;;  %v2390_v40 = vpop.eup %2389 }
 0x345   : > { %v859_v42 = vmul.f32 %v2390_v40, %v2380_v10 }
 0x346   : > { %v861_v28 = vpack.c.bf16 %v858_v26, %v857_v25 }
 0x348   : > { %2184 = vmatmul.mubr.msk.bf16.vlgmr.msra.gmra.mxu1 %vm426_vm0, %v861_v28 }
 0x349   : > { %2194 = vmatpush3.bf16.xpose.msra.mxu1 %v969_v29  ;;  %2195 = vmatprep.mubr.msk.bf16.mxu1 %vm2655_vm1, %v2654_v9 }
 0x34a   : > { %2205 = vmatprep.subr.bf16.mxu1 %v2654_v9 }
 0x36a   : > { %v852_v35 = vpop.xlane.xlu1 %851 }
 0x36b   : > { %2391 = vrcp.f32 %v852_v35 }
 0x36e   : > { %v961_v39 = vpop.permute.xlu1 %960 }
 0x36f   : > { %2196 = vmatmul.mubr.msk.bf16.vlgmr.msra.gmra.mxu1 %vm722_vm2, %v961_v39 }
 0x370   : > { %2207 = vmatprep.mubr.msk.bf16.mxu1 %vm2655_vm1, %v2654_v9 }
 0x372   : > { %v1014_v47 = vpop.permute.xlu1 %1013 }
 0x378   : > { %v2392_v41 = vpop.eup %2391 }
 0x379   : > { %v860_v43 = vmul.f32 %v2392_v41, %v2384_v17 }
 0x37b   : > { %v862_v44 = vpack.c.bf16 %v860_v43, %v859_v42 }
 0x37d   : > { %2190 = vmatmul.mubr.msk.bf16.vlgmr.msra.gmra.mxu0 %vm426_vm0, %v862_v44 }
 0x37e   : > { %2200 = vmatpush3.bf16.xpose.msra.mxu0 %v1022_v46  ;;  %2201 = vmatprep.mubr.msk.bf16.mxu0 %vm2655_vm1, %v2654_v9 }
 0x37f   : > { %2211 = vmatprep.subr.bf16.mxu0 %v2654_v9 }
 0x385   : > { %2202 = vmatmul.mubr.msk.bf16.vlgmr.msra.gmra.mxu0 %vm722_vm2, %v1014_v47 }
 0x386   : > { %2213 = vmatprep.mubr.msk.bf16.mxu0 %vm2655_vm1, %v2654_v9 }
 0x408   : > { %v900_v48 = vpop.f32.mrf.mxu1 }
 0x409   : > { %v951_v50 = vadd.f32 %v900_v48, %v2922_v33 }
 0x40a   : > { %v2185_v51 = vpop.f32.mrf.mxu1 }
 0x40b   : > { %955 = vst.msk [vmem:[#allocation2] sm:$0xff] %vm722_vm2, %v951_v50 }
 0x40c   : > { %v903_v52 = vpop.f32.mrf.mxu1 }
 0x40d   : > { %v952_v53 = vadd.f32 %v903_v52, %v2920_v32 }
 0x40e   : > { %v2186_v54 = vpop.f32.mrf.mxu1 }
 0x40f   : > { %956 = vst.msk [vmem:[#allocation2 + $0x8] sm:$0xff] %vm722_vm2, %v952_v53 }
 0x42f   : > { %v1005_v55 = vpop.f32.mrf.mxu1 }
 0x430   : > { %v1065_v56 = vsel %vm426_vm0, %v1005_v55, -inf }
 0x431   : > { %1066 = vmax.xlane.f32.xlu0 %v1065_v56  ;;  %v2197_v57 = vpop.f32.mrf.mxu1 }
 0x433   : > { %v1008_v58 = vpop.f32.mrf.mxu1 }
 0x434   : > { %v1068_v59 = vsel %vm426_vm0, %v1008_v58, -inf }
 0x435   : > { %1069 = vmax.xlane.f32.xlu1 %v1068_v59  ;;  %v2198_v60 = vpop.f32.mrf.mxu1 }
 0x43d   : > { %v944_v61 = vpop.f32.mrf.mxu0 }
 0x43e   : > { %v953_v62 = vadd.f32 %v944_v61, %v2929_v36 }
 0x43f   : > { %v2191_v63 = vpop.f32.mrf.mxu0 }
 0x440   : > { %957 = vst.msk [vmem:[#allocation2 + $0x10] sm:$0xff] %vm722_vm2, %v953_v62 }
 0x441   : > { %v947_v0 = vpop.f32.mrf.mxu0 }
 0x442   : > { %v954_v1 = vadd.f32 %v947_v0, %v2925_v34 }
 0x443   : > { %v2192_v2 = vpop.f32.mrf.mxu0 }
 0x444   : > { %958 = vst.msk [vmem:[#allocation2 + $0x18] sm:$0xff] %vm722_vm2, %v954_v1 }
 0x445   : > { %v1058_v3 = vpop.f32.mrf.mxu0 }
 0x446   : > { %v1071_v4 = vsel %vm426_vm0, %v1058_v3, -inf }
 0x447   : > { %v2203_v5 = vpop.f32.mrf.mxu0  ;;  %1072 = vmax.xlane.f32.xlu0 %v1071_v4 }
 0x449   : > { %v1061_v6 = vpop.f32.mrf.mxu0 }
 0x44a   : > { %v1074_v7 = vsel %vm426_vm0, %v1061_v6, -inf }
 0x44b   : > { %v2204_v8 = vpop.f32.mrf.mxu0  ;;  %1075 = vmax.xlane.f32.xlu0 %v1074_v7 }
 0x4ba   : > { %v1067_v10 = vpop.xlane.xlu0 %1066 }
 0x4bb   : > { %v1077_v11 = vsub.f32 %v1005_v55, %v1067_v10 }
 0x4bd   : > { %v1081_v12 = vmul.f32 1.442695, %v1077_v11 }
 0x4be   : > { %v1070_v13 = vpop.xlane.xlu1 %1069 }
 0x4bf   : > { %2393 = vpow2.f32 %v1081_v12  ;;  %v1078_v14 = vsub.f32 %v1008_v58, %v1070_v13 }
 0x4c1   : > { %v1083_v15 = vmul.f32 1.442695, %v1078_v14 }
 0x4c3   : > { %2395 = vpow2.f32 %v1083_v15 }
 0x4cc   : > { %v2394_v16 = vpop.eup %2393 }
 0x4cd   : > { %v1089_v17 = vsel %vm426_vm0, %v2394_v16, 0.0 }
 0x4ce   : > { %1090 = vadd.xlane.f32.xlu0 %v1089_v17 }
 0x4d0   : > { %v2396_v18 = vpop.eup %2395  ;;  %v1073_v19 = vpop.xlane.xlu0 %1072 }
 0x4d1   : > { %v1079_v20 = vsub.f32 %v1058_v3, %v1073_v19  ;;  %v1092_v21 = vsel %vm426_vm0, %v2396_v18, 0.0 }
 0x4d2   : > { %1093 = vadd.xlane.f32.xlu1 %v1092_v21 }
 0x4d3   : > { %v1085_v22 = vmul.f32 1.442695, %v1079_v20 }
 0x4d4   : > { %v1076_v26 = vpop.xlane.xlu0 %1075 }
 0x4d5   : > { %2397 = vpow2.f32 %v1085_v22  ;;  %v1080_v27 = vsub.f32 %v1061_v6, %v1076_v26 }
 0x4d7   : > { %v1087_v28 = vmul.f32 1.442695, %v1080_v27 }
 0x4d9   : > { %2399 = vpow2.f32 %v1087_v28 }
 0x4e2   : > { %v2398_v23 = vpop.eup %2397 }
 0x4e3   : > { %1234 = vrot.lane.b32.xlu1 %v2911_v24, %s2657_s25  ;;  %v1095_v25 = vsel %vm426_vm0, %v2398_v23, 0.0 }
 0x4e4   : > { %1096 = vadd.xlane.f32.xlu0 %v1095_v25 }
 0x4e6   : > { %v2400_v29 = vpop.eup %2399 }
 0x4e7   : > { %1160 = vrot.lane.b32.xlu1 %v2955_v49, %s2656_s21  ;;  %v1098_v30 = vsel %vm426_vm0, %v2400_v29, 0.0 }
 0x4fa   : > { %1112 = vrot.lane.b32.xlu0 %v2951_v45, %s2656_s21  ;;  %s1892_s21 = scalar_lea.sflag [#allocation5], %s2872_s3 }
 0x4fe   : > { %1232 = vrot.lane.b32.xlu0 %v2933_v37, %s2657_s25 }
 0x50b   : > { %1099 = vadd.xlane.f32.xlu1 %v1098_v30 }
 0x51c   : > { %1285 = vrot.lane.b32.xlu1 %v2918_v31, %s2657_s25 }
 0x520   : > { %1283 = vrot.lane.b32.xlu1 %v2938_v38, %s2657_s25 }
 0x557   : > { %v1091_v39 = vpop.xlane.xlu0 %1090 }
 0x55b   : > { %v1094_v35 = vpop.xlane.xlu1 %1093 }
 0x55c   : > { %2401 = vrcp.f32 %v1094_v35 }
 0x55d   : > { %2403 = vrcp.f32 %v1091_v39 }
 0x55f   : > { %v1235_v40 = vpop.permute.xlu1 %1234 }
 0x560   : > { %v1240_v51 = vsel %vm722_vm2, %v1235_v40, 0 }
 0x563   : > { %v1161_v41 = vpop.permute.xlu1 %1160 }
 0x564   : > { %2212 = vmatpush3.bf16.msra.mxu0 %v1161_v41 }
 0x565   : > { %2223 = vmatprep.subr.bf16.mxu0 %v2654_v9 }
 0x569   : > { %v2402_v42 = vpop.eup %2401 }
 0x56a   : > { %v2404_v44 = vpop.eup %2403  ;;  %v1106_v46 = vmul.f32 %v2402_v42, %v2396_v18 }
 0x56b   : > { %v1105_v48 = vmul.f32 %v2404_v44, %v2394_v16 }
 0x56d   : > { %v1097_v43 = vpop.xlane.xlu0 %1096  ;;  %v1109_v50 = vpack.c.bf16 %v1106_v46, %v1105_v48 }
 0x56e   : > { %2405 = vrcp.f32 %v1097_v43 }
 0x571   : > { %v1113_v47 = vpop.permute.xlu0 %1112 }
 0x572   : > { %2206 = vmatpush3.bf16.msra.mxu1 %v1113_v47 }
 0x573   : > { %2217 = vmatprep.subr.bf16.mxu1 %v2654_v9 }
 0x575   : > { %2208 = vmatmul.mubr.msk.bf16.vlgmr.msra.gmra.mxu1 %vm426_vm0, %v1109_v50  ;;  %v1233_v52 = vpop.permute.xlu0 %1232 }
 0x576   : > { %2218 = vmatpush3.bf16.xpose.msra.mxu1 %v1240_v51  ;;  %2219 = vmatprep.mubr.msk.bf16.mxu1 %vm2655_vm1, %v2654_v9 }
 0x577   : > { %2229 = vmatprep.subr.bf16.mxu1 %v2654_v9 }
 0x57b   : > { %v2406_v54 = vpop.eup %2405 }
 0x57c   : > { %v1107_v56 = vmul.f32 %v2406_v54, %v2398_v23 }
 0x57d   : > { %2220 = vmatmul.mubr.msk.bf16.vlgmr.msra.gmra.mxu1 %vm722_vm2, %v1233_v52 }
 0x57e   : > { %2231 = vmatprep.mubr.msk.bf16.mxu1 %vm2655_vm1, %v2654_v9 }
 0x594   : > { %v1100_v53 = vpop.xlane.xlu1 %1099 }
 0x595   : > { %2407 = vrcp.f32 %v1100_v53 }
 0x598   : > { %v1286_v58 = vpop.permute.xlu1 %1285 }
 0x599   : > { %v1291_v60 = vsel %vm722_vm2, %v1286_v58, 0 }
 0x59c   : > { %v1284_v61 = vpop.permute.xlu1 %1283 }
 0x5a2   : > { %v2408_v55 = vpop.eup %2407 }
 0x5a3   : > { %v1108_v57 = vmul.f32 %v2408_v55, %v2400_v29 }
 0x5a5   : > { %v1110_v59 = vpack.c.bf16 %v1108_v57, %v1107_v56 }
 0x5a7   : > { %2214 = vmatmul.mubr.msk.bf16.vlgmr.msra.gmra.mxu0 %vm426_vm0, %v1110_v59 }
 0x5a8   : > { %2224 = vmatpush3.bf16.xpose.msra.mxu0 %v1291_v60  ;;  %2225 = vmatprep.mubr.msk.bf16.mxu0 %vm2655_vm1, %v2654_v9 }
 0x5a9   : > { %2235 = vmatprep.subr.bf16.mxu0 %v2654_v9 }
 0x5af   : > { %2226 = vmatmul.mubr.msk.bf16.vlgmr.msra.gmra.mxu0 %vm722_vm2, %v1284_v61 }
 0x5b0   : > { %2237 = vmatprep.mubr.msk.bf16.mxu0 %vm2655_vm1, %v2654_v9 }
 0x635   : > { %v3037_v62 = vpop.f32.mrf.mxu1 }
 0x637   : > { %v2209_v63 = vpop.f32.mrf.mxu1 }
 0x639   : > { %v3039_v0 = vpop.f32.mrf.mxu1 }
 0x63b   : > { %v2210_v1 = vpop.f32.mrf.mxu1 }
 0x63d   : > { %v1276_v2 = vpop.f32.mrf.mxu1 }
 0x63e   : > { %v1334_v3 = vsel %vm426_vm0, %v1276_v2, -inf }
 0x63f   : > { %1335 = vmax.xlane.f32.xlu0 %v1334_v3  ;;  %v2221_v4 = vpop.f32.mrf.mxu1 }
 0x641   : > { %v1279_v5 = vpop.f32.mrf.mxu1 }
 0x642   : > { %v1337_v6 = vsel %vm426_vm0, %v1279_v5, -inf }
 0x643   : > { %1338 = vmax.xlane.f32.xlu1 %v1337_v6  ;;  %v2222_v7 = vpop.f32.mrf.mxu1 }
 0x667   : > { %v3043_v8 = vpop.f32.mrf.mxu0 }
 0x669   : > { %v2215_v10 = vpop.f32.mrf.mxu0 }
 0x66b   : > { %v3045_v11 = vpop.f32.mrf.mxu0 }
 0x66d   : > { %v2216_v12 = vpop.f32.mrf.mxu0 }
 0x66f   : > { %v1327_v13 = vpop.f32.mrf.mxu0 }
 0x670   : > { %v1340_v14 = vsel %vm426_vm0, %v1327_v13, -inf }
 0x671   : > { %v2227_v15 = vpop.f32.mrf.mxu0  ;;  %1341 = vmax.xlane.f32.xlu0 %v1340_v14 }
 0x673   : > { %v1330_v16 = vpop.f32.mrf.mxu0 }
 0x674   : > { %v1343_v17 = vsel %vm426_vm0, %v1330_v16, -inf }
 0x675   : > { %v2228_v18 = vpop.f32.mrf.mxu0  ;;  %1344 = vmax.xlane.f32.xlu0 %v1343_v17 }
 0x6c8   : > { %v1336_v19 = vpop.xlane.xlu0 %1335 }
 0x6c9   : > { %v1346_v20 = vsub.f32 %v1276_v2, %v1336_v19 }
 0x6cb   : > { %v1350_v21 = vmul.f32 1.442695, %v1346_v20 }
 0x6cc   : > { %v1339_v22 = vpop.xlane.xlu1 %1338 }
 0x6cd   : > { %2409 = vpow2.f32 %v1350_v21  ;;  %v1347_v23 = vsub.f32 %v1279_v5, %v1339_v22 }
 0x6cf   : > { %v1352_v25 = vmul.f32 1.442695, %v1347_v23 }
 0x6d1   : > { %2411 = vpow2.f32 %v1352_v25 }
 0x6da   : > { %v2410_v26 = vpop.eup %2409 }
 0x6db   : > { %v1358_v27 = vsel %vm426_vm0, %v2410_v26, 0.0 }
 0x6dc   : > { %1359 = vadd.xlane.f32.xlu0 %v1358_v27 }
 0x6de   : > { %v2412_v28 = vpop.eup %2411 }
 0x6df   : > { %v1361_v29 = vsel %vm426_vm0, %v2412_v28, 0.0 }
 0x6e0   : > { %1362 = vadd.xlane.f32.xlu1 %v1361_v29 }
 0x6f1   : > { %1501 = vrot.lane.b32.xlu1 %v2911_v24, %s2658_s28 }
 0x6f5   : > { %1427 = vrot.lane.b32.xlu1 %v2955_v49, %s2657_s25 }
 0x6fa   : > { %v1342_v30 = vpop.xlane.xlu0 %1341 }
 0x6fb   : > { %v1348_v35 = vsub.f32 %v1327_v13, %v1342_v30 }
 0x6fd   : > { %v1354_v39 = vmul.f32 1.442695, %v1348_v35 }
 0x6fe   : > { %v1345_v40 = vpop.xlane.xlu0 %1344 }
 0x6ff   : > { %2413 = vpow2.f32 %v1354_v39  ;;  %v1349_v41 = vsub.f32 %v1330_v16, %v1345_v40 }
 0x701   : > { %v1356_v42 = vmul.f32 1.442695, %v1349_v41 }
 0x703   : > { %2415 = vpow2.f32 %v1356_v42 }
 0x70c   : > { %v2414_v43 = vpop.eup %2413 }
 0x70d   : > { %v1364_v44 = vsel %vm426_vm0, %v2414_v43, 0.0 }
 0x70e   : > { %1365 = vadd.xlane.f32.xlu0 %v1364_v44 }
 0x710   : > { %v2416_v46 = vpop.eup %2415 }
 0x711   : > { %v1367_v47 = vsel %vm426_vm0, %v2416_v46, 0.0 }
 0x719   : > { %1368 = vadd.xlane.f32.xlu1 %v1367_v47 }
 0x724   : > { %1380 = vrot.lane.b32.xlu0 %v2951_v45, %s2657_s25  ;;  %s2573_s25 = scalar_lea.vmem %s3141_s26, 512 }
 0x725   : > { %p2574_p10 = scmp.ne.s32.totalorder %s3141_s26, %s2573_s25 }
 0x727   : > { %p2575_p7 = pnand %p2574_p10, %p3228_p12 }
 0x728   : > { %1499 = vrot.lane.b32.xlu0 %v2933_v37, %s2658_s28 }
 0x729   : > { %p2576_p1 = pneg %p2575_p7 }
 0x72a   : > { %1552 = vrot.lane.b32.xlu1 %v2918_v31, %s2658_s28 }
 0x72e   : > { %1550 = vrot.lane.b32.xlu1 %v2938_v38, %s2658_s28 }
 0x765   : > { %v1360_v51 = vpop.xlane.xlu0 %1359 }
 0x769   : > { %v1363_v24 = vpop.xlane.xlu1 %1362 }
 0x76a   : > { %2417 = vrcp.f32 %v1363_v24 }
 0x76b   : > { %2419 = vrcp.f32 %v1360_v51 }
 0x76d   : > { %v1502_v48 = vpop.permute.xlu1 %1501 }
 0x76e   : > { %v1507_v38 = vsel %vm722_vm2, %v1502_v48, 0 }
 0x771   : > { %v1428_v50 = vpop.permute.xlu1 %1427 }
 0x772   : > { %2236 = vmatpush3.bf16.msra.mxu0 %v1428_v50 }
 0x773   : > { %2247 = vmatprep.subr.bf16.mxu0 %v2654_v9 }
 0x777   : > { %v2418_v52 = vpop.eup %2417 }
 0x778   : > { %v2420_v54 = vpop.eup %2419  ;;  %v1375_v55 = vmul.f32 %v2418_v52, %v2412_v28 }
 0x779   : > { %v1374_v56 = vmul.f32 %v2420_v54, %v2410_v26 }
 0x77b   : > { %v1378_v31 = vpack.c.bf16 %v1375_v55, %v1374_v56 }
 0x797   : > { %v1366_v53 = vpop.xlane.xlu0 %1365 }
 0x798   : > { %2421 = vrcp.f32 %v1366_v53 }
 0x79b   : > { %v1381_v37 = vpop.permute.xlu0 %1380 }
 0x79c   : > { %2230 = vmatpush3.bf16.msra.mxu1 %v1381_v37 }
 0x79d   : > { %2241 = vmatprep.subr.bf16.mxu1 %v2654_v9 }
 0x79f   : > { %2232 = vmatmul.mubr.msk.bf16.vlgmr.msra.gmra.mxu1 %vm426_vm0, %v1378_v31  ;;  %v1500_v58 = vpop.permute.xlu0 %1499 }
 0x7a0   : > { %2242 = vmatpush3.bf16.xpose.msra.mxu1 %v1507_v38  ;;  %2243 = vmatprep.mubr.msk.bf16.mxu1 %vm2655_vm1, %v2654_v9 }
 0x7a1   : > { %2253 = vmatprep.subr.bf16.mxu1 %v2654_v9 }
 0x7a2   : > { %v1369_v57 = vpop.xlane.xlu1 %1368 }
 0x7a3   : > { %2423 = vrcp.f32 %v1369_v57 }
 0x7a5   : > { %v2422_v59 = vpop.eup %2421 }
 0x7a6   : > { %v1376_v61 = vmul.f32 %v2422_v59, %v2414_v43  ;;  %v1553_v1 = vpop.permute.xlu1 %1552 }
 0x7a7   : > { %2244 = vmatmul.mubr.msk.bf16.vlgmr.msra.gmra.mxu1 %vm722_vm2, %v1500_v58  ;;  %v1558_v3 = vsel %vm722_vm2, %v1553_v1, 0 }
 0x7a8   : > { %2255 = vmatprep.mubr.msk.bf16.mxu1 %vm2655_vm1, %v2654_v9 }
 0x7aa   : > { %v1551_v4 = vpop.permute.xlu1 %1550 }
 0x7b0   : > { %v2424_v60 = vpop.eup %2423 }
 0x7b1   : > { %v1377_v63 = vmul.f32 %v2424_v60, %v2416_v46 }
 0x7b3   : > { %v1379_v2 = vpack.c.bf16 %v1377_v63, %v1376_v61 }
 0x7b5   : > { %2238 = vmatmul.mubr.msk.bf16.vlgmr.msra.gmra.mxu0 %vm426_vm0, %v1379_v2 }
 0x7b6   : > { %2248 = vmatpush3.bf16.xpose.msra.mxu0 %v1558_v3  ;;  %2249 = vmatprep.mubr.msk.bf16.mxu0 %vm2655_vm1, %v2654_v9 }
 0x7b7   : > { %2259 = vmatprep.subr.bf16.mxu0 %v2654_v9 }
 0x7bd   : > { %2250 = vmatmul.mubr.msk.bf16.vlgmr.msra.gmra.mxu0 %vm722_vm2, %v1551_v4 }
 0x7be   : > { %2261 = vmatprep.mubr.msk.bf16.mxu0 %vm2655_vm1, %v2654_v9 }
 0x85f   : > { %v1420_v5 = vpop.f32.mrf.mxu1 }
 0x861   : > { %v2233_v6 = vpop.f32.mrf.mxu1 }
 0x863   : > { %v1423_v7 = vpop.f32.mrf.mxu1 }
 0x865   : > { %v2234_v10 = vpop.f32.mrf.mxu1 }
 0x867   : > { %v1543_v12 = vpop.f32.mrf.mxu1 }
 0x868   : > { %v1601_v13 = vsel %vm426_vm0, %v1543_v12, -inf }
 0x869   : > { %1602 = vmax.xlane.f32.xlu0 %v1601_v13  ;;  %v2245_v14 = vpop.f32.mrf.mxu1 }
 0x86b   : > { %v1546_v15 = vpop.f32.mrf.mxu1 }
 0x86c   : > { %v1604_v16 = vsel %vm426_vm0, %v1546_v15, -inf }
 0x86d   : > { %1605 = vmax.xlane.f32.xlu1 %v1604_v16  ;;  %v2246_v17 = vpop.f32.mrf.mxu1 }
 0x875   : > { %v1467_v18 = vpop.f32.mrf.mxu0 }
 0x877   : > { %v2239_v19 = vpop.f32.mrf.mxu0 }
 0x879   : > { %v1470_v20 = vpop.f32.mrf.mxu0 }
 0x87b   : > { %v2240_v21 = vpop.f32.mrf.mxu0 }
 0x87c   : > { %v1772_v21 = vld [vmem:[#allocation11 + $0x10] sm:$0xff] }
 0x87d   : > { %v1594_v22 = vpop.f32.mrf.mxu0 }
 0x87e   : > { %v1607_v9 = vsel %vm426_vm0, %v1594_v22, -inf }
 0x87f   : > { %v2251_v23 = vpop.f32.mrf.mxu0  ;;  %1608 = vmax.xlane.f32.xlu0 %v1607_v9  ;;  %v1770_v9 = vld [vmem:[#allocation11] sm:$0xff] }
 0x881   : > { %v1597_v25 = vpop.f32.mrf.mxu0 }
 0x882   : > { %v1610_v26 = vsel %vm426_vm0, %v1597_v25, -inf }
 0x883   : > { %v2252_v27 = vpop.f32.mrf.mxu0  ;;  %1611 = vmax.xlane.f32.xlu0 %v1610_v26 }
 0x8f2   : > { %v1603_v28 = vpop.xlane.xlu0 %1602 }
 0x8f3   : > { %v1613_v29 = vsub.f32 %v1543_v12, %v1603_v28 }
 0x8f5   : > { %v1617_v30 = vmul.f32 1.442695, %v1613_v29 }
 0x8f6   : > { %v1606_v35 = vpop.xlane.xlu1 %1605 }
 0x8f7   : > { %2425 = vpow2.f32 %v1617_v30  ;;  %v1614_v39 = vsub.f32 %v1546_v15, %v1606_v35 }
 0x8f9   : > { %v1619_v40 = vmul.f32 1.442695, %v1614_v39 }
 0x8fb   : > { %2427 = vpow2.f32 %v1619_v40 }
 0x904   : > { %v2426_v41 = vpop.eup %2425 }
 0x905   : > { %v1625_v42 = vsel %vm426_vm0, %v2426_v41, 0.0 }
 0x906   : > { %1626 = vadd.xlane.f32.xlu0 %v1625_v42 }
 0x908   : > { %v2428_v43 = vpop.eup %2427  ;;  %v1609_v44 = vpop.xlane.xlu0 %1608 }
 0x909   : > { %v1615_v46 = vsub.f32 %v1594_v22, %v1609_v44  ;;  %v1628_v47 = vsel %vm426_vm0, %v2428_v43, 0.0  ;;  %v1771_v22 = vld [vmem:[#allocation11 + $0x8] sm:$0xff] }
 0x90a   : > { %1629 = vadd.xlane.f32.xlu1 %v1628_v47 }
 0x90b   : > { %v1621_v24 = vmul.f32 1.442695, %v1615_v46 }
 0x90c   : > { %v1612_v48 = vpop.xlane.xlu0 %1611 }
 0x90d   : > { %2429 = vpow2.f32 %v1621_v24  ;;  %v1616_v50 = vsub.f32 %v1597_v25, %v1612_v48 }
 0x90f   : > { %v1623_v51 = vmul.f32 1.442695, %v1616_v50  ;;  %v2066_v50 = vld [vmem:[%s3200_s8] ss:$0 sm:$0xff] }
 0x911   : > { %2431 = vpow2.f32 %v1623_v51 }
 0x91a   : > { %v2430_v52 = vpop.eup %2429 }
 0x91b   : > { %v1631_v53 = vsel %vm426_vm0, %v2430_v52, 0.0 }
 0x91c   : > { %1632 = vadd.xlane.f32.xlu0 %v1631_v53 }
 0x91e   : > { %v2432_v54 = vpop.eup %2431 }
 0x91f   : > { %v1634_v55 = vsel %vm426_vm0, %v2432_v54, 0.0 }
 0x920   : > { %1635 = vadd.xlane.f32.xlu1 %v1634_v55 }
 0x931   : > { %1694 = vrot.lane.b32.xlu1 %v2955_v49, %s2658_s28 }
 0x932   : > { %1647 = vrot.lane.b32.xlu0 %v2951_v45, %s2658_s28  ;;  %s2577_s28 = sshll.u32 %s2662_s13, 4  ;;  %s2578_s28 = int_to_ptr.vmem [resolvable:$false] %s2577_s28 }
 0x933   : > { %p2580_p13 = scmp.lt.s32.totalorder %s3141_s26, %s2578_s28 }
 0x935   : > { %1211 = vrot.lane.b32.xlu1 %v3037_v62, %s2659_s1 }
 0x936   : > { %1478 = vrot.lane.b32.xlu0 %v1420_v5, %s2660_s29 }
 0x939   : > { %1213 = vrot.lane.b32.xlu1 %v3039_v0, %s2659_s1 }
 0x93a   : > { %1215 = vrot.lane.b32.xlu0 %v3043_v8, %s2659_s1 }
 0x93d   : > { %1480 = vrot.lane.b32.xlu1 %v1423_v7, %s2660_s29 }
 0x93e   : > { %1482 = vrot.lane.b32.xlu0 %v1467_v18, %s2660_s29 }
 0x941   : > { %1217 = vrot.lane.b32.xlu1 %v3045_v11, %s2659_s1 }
 0x945   : > { %1484 = vrot.lane.b32.xlu1 %v1470_v20, %s2660_s29  ;;  %v1773_v20 = vld [vmem:[#allocation11 + $0x18] sm:$0xff]  ;;  %s2579_s29 = scalar_lea.vmem %s2578_s28, 1024 }
 0x946   : > { %p2581_p0 = scmp.lt.s32.totalorder %s2579_s29, %s2573_s25 }
 0x948   : > { %p2582_p11 = por %p2581_p0, %p2580_p13 }
 0x94a   : > { %p2583_p5 = pnand %p2582_p11, %p2576_p1 }
 0x98f   : > { %v1627_v45 = vpop.xlane.xlu0 %1626 }
 0x993   : > { %v1630_v49 = vpop.xlane.xlu1 %1629 }
 0x994   : > { %2433 = vrcp.f32 %v1630_v49 }
 0x995   : > { %2435 = vrcp.f32 %v1627_v45 }
 0x9a1   : > { %v2434_v37 = vpop.eup %2433 }
 0x9a2   : > { %v2436_v56 = vpop.eup %2435  ;;  %v1642_v31 = vmul.f32 %v2434_v37, %v2428_v43 }
 0x9a3   : > { %v1641_v57 = vmul.f32 %v2436_v56, %v2426_v41 }
 0x9a5   : > { %v1633_v62 = vpop.xlane.xlu0 %1632  ;;  %v1645_v8 = vpack.c.bf16 %v1642_v31, %v1641_v57 }
 0x9a6   : > { %2437 = vrcp.f32 %v1633_v62 }
 0x9a9   : > { %v1648_v38 = vpop.permute.xlu0 %1647  ;;  %v1636_v0 = vpop.xlane.xlu1 %1635 }
 0x9aa   : > { %2439 = vrcp.f32 %v1636_v0  ;;  %2254 = vmatpush3.bf16.msra.mxu1 %v1648_v38 }
 0x9ab   : > { %2265 = vmatprep.subr.mxu1 %v1773_v20 }
 0x9ad   : > { %v1479_v58 = vpop.permute.xlu0 %1478  ;;  %2256 = vmatmul.mubr.msk.bf16.vlgmr.msra.gmra.mxu1 %vm426_vm0, %v1645_v8  ;;  %v1695_v11 = vpop.permute.xlu1 %1694 }
 0x9ae   : > { %2260 = vmatpush3.bf16.msra.mxu0 %v1695_v11  ;;  %v1490_v1 = vadd.f32 %v1479_v58, %v2922_v33  ;;  %2266 = vmatpush3.msra.mxu1 %v1773_v20 }
 0x9af   : > { %2267 = vmatprep.subr.mxu1 %v1772_v21 }
 0x9b0   : > { %2268 = vmatpush3.msra.mxu1 %v1772_v21 }
 0x9b1   : > { %v1216_v59 = vpop.permute.xlu0 %1215  ;;  %v1212_v60 = vpop.permute.xlu1 %1211  ;;  %2269 = vmatprep.subr.mxu1 %v1771_v22 }
 0x9b2   : > { %v1225_v61 = vadd.f32 %v1216_v59, %v2929_v36  ;;  %v1223_v63 = vadd.f32 %v1212_v60, %v2922_v33  ;;  %2270 = vmatpush3.msra.mxu1 %v1771_v22 }
 0x9b3   : > { %v2438_v2 = vpop.eup %2437  ;;  %2271 = vmatprep.subr.mxu1 %v1770_v9 }
 0x9b4   : > { %1230 = vst.msk [vmem:[#allocation2 + $0x10] sm:$0xff] %vm1227_vm3, %v1225_v61  ;;  %1228 = vst.msk [vmem:[#allocation2] sm:$0xff] %vm1227_vm3, %v1223_v63  ;;  %v1643_v10 = vmul.f32 %v2438_v2, %v2430_v52  ;;  %2272 = vmatpush3.msra.mxu1 %v1770_v9 }
 0x9b5   : > { %v1483_v3 = vpop.permute.xlu0 %1482  ;;  %1495 = vst.msk [vmem:[#allocation2] sm:$0xff] %vm1494_vm4, %v1490_v1  ;;  %v1214_v4 = vpop.permute.xlu1 %1213 }
 0x9b6   : > { %v1492_v5 = vadd.f32 %v1483_v3, %v2929_v36  ;;  %v1224_v6 = vadd.f32 %v1214_v4, %v2920_v32 }
 0x9b7   : > { %v2440_v7 = vpop.eup %2439 }
 0x9b8   : > { %1497 = vst.msk [vmem:[#allocation2 + $0x10] sm:$0xff] %vm1494_vm4, %v1492_v5  ;;  %v1644_v12 = vmul.f32 %v2440_v7, %v2432_v54 }
 0x9b9   : > { %1229 = vst.msk [vmem:[#allocation2 + $0x8] sm:$0xff] %vm1227_vm3, %v1224_v6  ;;  %v1481_v13 = vpop.permute.xlu1 %1480 }
 0x9ba   : > { %v1491_v14 = vadd.f32 %v1481_v13, %v2920_v32  ;;  %v1646_v15 = vpack.c.bf16 %v1644_v12, %v1643_v10 }
 0x9bc   : > { %1496 = vst.msk [vmem:[#allocation2 + $0x8] sm:$0xff] %vm1494_vm4, %v1491_v14  ;;  %2262 = vmatmul.mubr.msk.bf16.vlgmr.msra.gmra.mxu0 %vm426_vm0, %v1646_v15 }
 0x9bd   : > { %v1218_v16 = vpop.permute.xlu1 %1217 }
 0x9be   : > { %v1226_v17 = vadd.f32 %v1218_v16, %v2925_v34 }
 0x9c0   : > { %1231 = vst.msk [vmem:[#allocation2 + $0x18] sm:$0xff] %vm1227_vm3, %v1226_v17 }
 0x9c1   : > { %v1485_v18 = vpop.permute.xlu1 %1484 }
 0x9c2   : > { %v1493_v19 = vadd.f32 %v1485_v18, %v2925_v34 }
 0x9c4   : > { %1498 = vst.msk [vmem:[#allocation2 + $0x18] sm:$0xff] %vm1494_vm4, %v1493_v19 }
 0xa6d   : > { %v1687_v23 = vpop.f32.mrf.mxu1 }
 0xa6e   : > { %1745 = vrot.lane.b32.xlu0 %v1687_v23, %s2661_s22 }
 0xa6f   : > { %v2257_v25 = vpop.f32.mrf.mxu1 }
 0xa71   : > { %v1690_v26 = vpop.f32.mrf.mxu1 }
 0xa72   : > { %1747 = vrot.lane.b32.xlu1 %v1690_v26, %s2661_s22 }
 0xa73   : > { %v2258_v27 = vpop.f32.mrf.mxu1 }
 0xa7c   : > { %v1734_v28 = vpop.f32.mrf.mxu0 }
 0xa7d   : > { %1749 = vrot.lane.b32.xlu0 %v1734_v28, %s2661_s22 }
 0xa7e   : > { %v2263_v29 = vpop.f32.mrf.mxu0 }
 0xa80   : > { %v1737_v30 = vpop.f32.mrf.mxu0 }
 0xa81   : > { %1751 = vrot.lane.b32.xlu1 %v1737_v30, %s2661_s22 }
 0xa82   : > { %v2264_v35 = vpop.f32.mrf.mxu0 }
 0xae0   : > { %v1746_v39 = vpop.permute.xlu0 %1745 }
 0xae1   : > { %v1757_v40 = vadd.f32 %v1746_v39, %v2922_v33 }
 0xae3   : > { %1762 = vst.msk [vmem:[#allocation2] sm:$0xff] %vm1761_vm5, %v1757_v40 }
 0xae4   : > { %v1748_v41 = vpop.permute.xlu1 %1747 }
 0xae5   : > { %v1758_v42 = vadd.f32 %v1748_v41, %v2920_v32 }
 0xae7   : > { %1763 = vst.msk [vmem:[#allocation2 + $0x8] sm:$0xff] %vm1761_vm5, %v1758_v42 }
 0xaea   : > { %v1766_v43 = vld [vmem:[#allocation2] sm:$0xff] }
 0xaeb   : > { %2273 = vmatprep.mubr.msk.f32.mxu1 %vm1781_vm6, %v1766_v43 }
 0xaee   : > { %v1767_v44 = vld [vmem:[#allocation2 + $0x8] sm:$0xff] }
 0xaef   : > { %v1750_v46 = vpop.permute.xlu0 %1749  ;;  %2274 = vmatmul.mubr.msk.f32.vlgmr.msra.gmra.mxu1 %vm1781_vm6, %v1767_v44 }
 0xaf0   : > { %v1759_v47 = vadd.f32 %v1750_v46, %v2929_v36 }
 0xaf2   : > { %1764 = vst.msk [vmem:[#allocation2 + $0x10] sm:$0xff] %vm1761_vm5, %v1759_v47 }
 0xaf3   : > { %v1752_v33 = vpop.permute.xlu1 %1751 }
 0xaf4   : > { %v1760_v24 = vadd.f32 %v1752_v33, %v2925_v34 }
 0xaf6   : > { %1765 = vst.msk [vmem:[#allocation2 + $0x18] sm:$0xff] %vm1761_vm5, %v1760_v24 }
 0xaf9   : > { %v1768_v32 = vld [vmem:[#allocation2 + $0x10] sm:$0xff] }
 0xafa   : > { %2276 = vmatprep.mubr.msk.f32.mxu1 %vm1781_vm6, %v1768_v32 }
 0xafd   : > { %v1769_v48 = vld [vmem:[#allocation2 + $0x18] sm:$0xff] }
 0xafe   : > { %2277 = vmatmul.mubr.msk.f32.gmra.mxu1 %vm1781_vm6, %v1769_v48 }
 0xbaf   : > { %v2275_v51 = vpop.f32.mrf.mxu1 }
 0xbb0   : > { %v1866_v36 = vadd.f32 %v2275_v51, %v2066_v50 }
 0xbb1   : > { %v1860_v52 = vpop.f32.mrf.mxu1 }
 0xbb2   : > { %v1880_v53 = vmax.f32 %v1866_v36, 0.0  ;;  %v1861_v54 = vadd.f32 %v2066_v50, %v1860_v52 }
 0xbb4   : > { %v1884_v55 = vadd.f32 %v1880_v53, %v1767_v44  ;;  %v1879_v34 = vmax.f32 %v1861_v54, 0.0 }
 0xbb6   : > { %1888 = vst.msk [vmem:[%s409_s17 + $0x8] sm:$0xff] %vm1781_vm6, %v1884_v55  ;;  %v1883_v49 = vadd.f32 %v1879_v34, %v1766_v43 }
 0xbb8   : > { %1887 = vst.msk [vmem:[%s409_s17] sm:$0xff] %vm1781_vm6, %v1883_v49 }
 0xbbe   : > { %v2278_v45 = vpop.f32.mrf.mxu1 }
 0xbbf   : > { %v1876_v37 = vadd.f32 %v2278_v45, %v2066_v50 }
 0xbc0   : > { %v1870_v62 = vpop.f32.mrf.mxu1 }
 0xbc1   : > { %v1882_v56 = vmax.f32 %v1876_v37, 0.0  ;;  %v1871_v31 = vadd.f32 %v2066_v50, %v1870_v62 }
 0xbc3   : > { %v1886_v38 = vadd.f32 %v1882_v56, %v1769_v48  ;;  %v1881_v0 = vmax.f32 %v1871_v31, 0.0 }
 0xbc5   : > { %1890 = vst.msk [vmem:[%s409_s17 + $0x18] sm:$0xff] %vm1781_vm6, %v1886_v38  ;;  %v1885_v57 = vadd.f32 %v1881_v0, %v1768_v32 }
 0xbc7   : > { %1889 = vst.msk [vmem:[%s409_s17 + $0x10] sm:$0xff] %vm1781_vm6, %v1885_v57 }
 0xbc8   : > { %2586 = shalt.err (!%p2583_p5)
}
 0xbc9   : > { %s2587_s22 = scalar_lea.hbm %s3147_s24, 512  ;;  %s2591_s17 = scalar_lea.hbm %s3201_s9, 1024 }
 0xbca   : > { %p2588_p6 = scmp.ne.s32.totalorder %s3147_s24, %s2587_s22  ;;  %p2592_p9 = scmp.lt.s32.totalorder %s3147_s24, %s3201_s9 }
 0xbcb   : > { %p2593_p2 = scmp.lt.s32.totalorder %s2591_s17, %s2587_s22 }
 0xbcc   : > { %p2589_p4 = pnand %p2588_p6, %p3228_p12 }
 0xbcd   : > { %p2594_p3 = por %p2593_p2, %p2592_p9 }
 0xbce   : > { %p2590_p8 = pneg %p2589_p4 }
 0xbd0   : > { %p2595_p10 = pnand %p2594_p3, %p2590_p8 }
 0xbd2   : > { %2598 = shalt.err (!%p2595_p10)
}
 0xbd3   : > { %s2663_s20 = smov 128  }
 0xbd4   : > { %2297 = dma.vmem_to_hbm [thread:$0]  (%p3228_p12), %s3141_s26, 512, %s3147_s24, %s1892_s21, %s2663_s20, %s2663_s20, %s2659_s1  }
 0xbd5 PF: > { %s1921_s25 = sand.u32 1, %s2633_s30   ;;  %p3229_p7 = scmp.ne.s32.totalorder %s3212_s16, 0 }
 0xbd6   : > { %p3230_p1 = scmp.ge.s32.totalorder %s2645_s12, 2  ;;  %s1922_s13 = scalar_lea.sflag [#allocation5], %s1921_s25 }
 0xbd8   : > { %p2317_p13 = pnand %p3230_p1, %p3229_p7 }
 0xbda   : > { %p2318_p0 = pneg %p2317_p13 }
 0xbdc   : > { %2628 = dma.done.wait (%p2318_p0), %s1922_s13, 512  }
 0xbdd   : > { %2630 = vsyncadd (%p2318_p0), %s1922_s13, 4294966784  ;;  %p24_p11 = scmp.ge.s32.totalorder %s2814_s18, 4   ;;  %s3231_s30 = smov %s2637_s10 }
 0xbde   : > { %s3232_s10 = smov %s2641_s11  ;;  %s3233_s11 = smov %s2830_s23 }
 0xbdf   : > { %s3234_s12 = smov %s2814_s18  ;;  %26 = sbr.rel (!%p24_p11) target bundleno = 11 (0xb), region = 117 }
 0xbe4   :  { %1927 = vsyncpa [#allocation4], 1 }
 0xbe5   :  { %1929 = vsyncpa [#allocation4 + $0x1], 1 }
 0xbe6   :  { %1930 = vsyncpa [#allocation7], 1 }
 0xbe7   :  { %1931 = vsyncpa [#allocation10], 1 }
 0xbe8   :  { %1932 = vsyncpa [#allocation5], 1 }
 0xbe9   :  { %1934 = vsyncpa [#allocation5 + $0x1], 1 }

</bundles_post_ra>
